<compile_context>
chip_gen: v6e
topology: v6e:2x2x1
jax: 0.10.0
libtpu: 0.0.40
codegen_flags: <defaults>
</compile_context>

<pallas_src>
import functools

import jax
import jax.numpy as jnp
from jax import lax
from jax.experimental import pallas as pl
from jax.experimental.pallas import tpu as pltpu


def _round_up(x, m):
    return ((x + m - 1) // m) * m


def make_rnn2_kernel(n_layers, t_chunk, seq_len, n_chunks, b_blk, h_pad):
    """Kernel over one (batch-block, time-chunk); recurrence carried in vregs."""
    needs_mask = (n_chunks * t_chunk != seq_len)

    def kernel(*refs):
        n_in = 2 + 2 * (n_layers - 1)
        xp_ref = refs[0]              # (tc, b_blk, H)  precomputed x@Wih0 + biases
        whh0_ref = refs[1]            # (H, H)
        layer_refs = refs[2:n_in]     # per layer >=1: W_cat (2H,H), bias (1,H)
        hseq_ref = refs[n_in]         # (tc, b_blk, H)  last-layer hidden per step
        hid_ref = refs[n_in + 1]      # (n_layers, b_blk, H) resident state carrier

        c = pl.program_id(1)          # time-chunk index (innermost, 'arbitrary')

        # Weights: loaded once per chunk; constant index_map keeps them resident.
        whh0 = whh0_ref[...]
        w_cat = [layer_refs[2 * i][...] for i in range(n_layers - 1)]
        # Bias broadcast hoisted out of the (unrolled) time loop: one broadcast
        # per chunk per layer, not one per step (JAX does not CSE broadcasts).
        bias = [jnp.broadcast_to(layer_refs[2 * i + 1][...], (b_blk, h_pad))
                for i in range(n_layers - 1)]

        zeros = jnp.zeros((b_blk, h_pad), jnp.float32)
        if n_chunks == 1:
            # Whole sequence in one chunk: zero init is static, no VMEM read.
            h0 = (zeros,) * n_layers
        else:
            # In-register zero init on the first chunk of each batch block
            # (no zero-store + readback through the resident output block).
            h0 = tuple(jnp.where(c == 0, zeros, hid_ref[l])
                       for l in range(n_layers))

        def step(t, hs):
            # Layer 0: x@W_ih_0 + b_ih_0 + b_hh_0 was precomputed for all t in
            # the wrapper (one lane-dense GEMM); only the recurrent dot remains.
            h_new = jnp.maximum(
                xp_ref[t] + jnp.dot(hs[0], whh0,
                                    preferred_element_type=jnp.float32),
                0.0)
            new = [h_new]
            inp = h_new
            for l in range(1, n_layers):
                # Fused ih/hh matmul: one MXU pass on [inp, h_prev] @ [[Wih],[Whh]]
                # with a single pre-fused bias.
                cat = jnp.concatenate([inp, hs[l]], axis=-1)     # (b_blk, 2H)
                inp = jnp.maximum(
                    jnp.dot(cat, w_cat[l - 1],
                            preferred_element_type=jnp.float32) + bias[l - 1],
                    0.0)
                new.append(inp)
            if needs_mask:
                # Freeze state on zero-padded trailing timesteps so the returned
                # hidden equals the state after the last *real* timestep.
                valid = (c * t_chunk + t) < seq_len
                new = [jnp.where(valid, hn, ho) for hn, ho in zip(new, hs)]
                inp = new[-1]
            hseq_ref[t] = inp          # lane-dense store (H padded to 128 lanes)
            return tuple(new)

        # Static trip count; bounded unrolling lets the scheduler overlap MXU
        # pushes of adjacent timesteps without unbounded vreg live ranges.
        unroll = True if t_chunk <= 32 else 8
        hs_final = lax.fori_loop(0, t_chunk, step, h0, unroll=unroll)

        for l in range(n_layers):
            hid_ref[l] = hs_final[l]

    return kernel


def rnn2_forward(x, params, n_layers, hidden_dim, output_size,
                 t_chunk_max=256, lane_multiple=128):
    """x: (B, T, I) batch_first f32 -> (out (B,T,O), hidden (n_layers,B,H))."""
    B, T, I = x.shape
    H = hidden_dim

    # Pad hidden to full lanes (128; set lane_multiple=256 on v6e/v7x to fill
    # the 256-wide MXU) and batch to full f32 sublanes (8). Padded lanes of the
    # weights/biases are zero, so padded hidden lanes stay exactly zero.
    HP = _round_up(H, lane_multiple)
    n_b = 2 if B > 8 else 1            # 2 batch blocks -> work for both v7x TCs
    b_blk = _round_up(pl.cdiv(B, n_b), 8)
    BP = n_b * b_blk

    # Time-chunk length from a VMEM working-set budget so the 2-deep pipeline
    # survives v7x's 64 MiB VMEM: 2x xp-in + 2x hseq-out slabs per chunk, plus
    # the resident hidden block and the (small) weights.
    per_t = 4 * b_blk * HP * 4
    fixed = 2 * n_layers * b_blk * HP * 4
    fixed += 2 * 4 * (HP * HP + (n_layers - 1) * (2 * HP * HP + HP))
    budget = 32 << 20
    tc = int(max(8, min(t_chunk_max, (budget - fixed) // per_t)))
    tc = min(tc, T)
    n_c = pl.cdiv(T, tc)
    TP = n_c * tc                      # pad T so every chunk has a static trip count

    def pad2(a, r, c):
        return jnp.pad(a, ((0, r - a.shape[0]), (0, c - a.shape[1])))

    layers = params["layers"]
    wih0, bih0, whh0, bhh0 = layers[0]

    # Layer-0 input projection for ALL timesteps as one lane-dense f32 GEMM,
    # layer-0 biases folded in. HIGHEST precision matches the in-kernel f32
    # dots and the f32 PyTorch reference.
    x_tm = jnp.transpose(x, (1, 0, 2))                           # (T, B, I)
    x_tm = jnp.pad(x_tm, ((0, TP - T), (0, BP - B), (0, 0)))
    xp = (jnp.einsum("tbi,ih->tbh", x_tm, pad2(wih0, I, HP),
                     precision=lax.Precision.HIGHEST)
          + pad2(bih0 + bhh0, 1, HP))                            # (TP, BP, HP)

    flat = [xp, pad2(whh0, HP, HP)]
    in_specs = [
        pl.BlockSpec((tc, b_blk, HP), lambda b, c: (c, b, 0)),
        pl.BlockSpec((HP, HP), lambda b, c: (0, 0)),
    ]
    for l in range(1, n_layers):
        wih_l, bih_l, whh_l, bhh_l = layers[l]
        # Stacked (2H, H) weight so the kernel does ONE dot per layer per step;
        # per-layer biases pre-fused (host-side, free).
        w_cat = jnp.concatenate([pad2(wih_l, HP, HP), pad2(whh_l, HP, HP)],
                                axis=0)
        flat += [w_cat, pad2(bih_l + bhh_l, 1, HP)]
        in_specs += [pl.BlockSpec((2 * HP, HP), lambda b, c: (0, 0)),
                     pl.BlockSpec((1, HP), lambda b, c: (0, 0))]

    out_shapes = (
        jax.ShapeDtypeStruct((TP, BP, HP), jnp.float32),         # last-layer h seq
        jax.ShapeDtypeStruct((n_layers, BP, HP), jnp.float32),   # final hidden
    )
    out_specs = (
        pl.BlockSpec((tc, b_blk, HP), lambda b, c: (c, b, 0)),
        # Constant index over the 'arbitrary' time axis => resident state carrier.
        pl.BlockSpec((n_layers, b_blk, HP), lambda b, c: (0, b, 0)),
    )

    hseq, hidden = pl.pallas_call(
        make_rnn2_kernel(n_layers, tc, T, n_c, b_blk, HP),
        out_shape=out_shapes,
        grid_spec=pltpu.PrefetchScalarGridSpec(
            num_scalar_prefetch=0,
            grid=(n_b, n_c),            # batch blocks (parallel) x time chunks
            in_specs=in_specs,
            out_specs=out_specs,
        ),
        compiler_params=pltpu.CompilerParams(
            dimension_semantics=("parallel", "arbitrary"),
            vmem_limit_bytes=48 << 20,  # > 16/32 MiB scoped defaults, < v7x 64 MiB
        ),
    )(*flat)

    # FC head (O=3 << 128 lanes) as one GEMM outside the serial recurrence.
    out_tm = (jnp.einsum("tbh,ho->tbo", hseq[:T, :B, :H], params["w_fc"],
                         precision=lax.Precision.HIGHEST)
              + params["b_fc"])
    out = jnp.transpose(out_tm, (1, 0, 2))                       # (B, T, O)
    return out, hidden[:, :B, :H]


def init_params(key, input_size, hidden_dim, output_size, n_layers):
    """Deterministic synthetic init, U(-1/sqrt(H), 1/sqrt(H)) like PyTorch."""
    k = 1.0 / float(hidden_dim) ** 0.5
    layers = []
    for l in range(n_layers):
        in_dim = input_size if l == 0 else hidden_dim
        key, k1, k2, k3, k4 = jax.random.split(key, 5)
        wih = jax.random.uniform(k1, (in_dim, hidden_dim), jnp.float32, -k, k)
        bih = jax.random.uniform(k2, (1, hidden_dim), jnp.float32, -k, k)
        whh = jax.random.uniform(k3, (hidden_dim, hidden_dim), jnp.float32, -k, k)
        bhh = jax.random.uniform(k4, (1, hidden_dim), jnp.float32, -k, k)
        layers.append((wih, bih, whh, bhh))
    key, k5, k6 = jax.random.split(key, 3)
    w_fc = jax.random.uniform(k5, (hidden_dim, output_size), jnp.float32, -k, k)
    b_fc = jax.random.uniform(k6, (1, output_size), jnp.float32, -k, k)
    return {"layers": layers, "w_fc": w_fc, "b_fc": b_fc}


def rnn2_ref(x, params, n_layers):
    """Pure-JAX reference of the PyTorch forward."""
    B, T, _ = x.shape
    H = params["layers"][0][2].shape[0]
    h = [jnp.zeros((B, H), jnp.float32) for _ in range(n_layers)]
    outs = []
    for t in range(T):
        inp = x[:, t, :]
        for l in range(n_layers):
            wih, bih, whh, bhh = params["layers"][l]
            h[l] = jnp.maximum(inp @ wih + bih + h[l] @ whh + bhh, 0.0)
            inp = h[l]
        outs.append(inp @ params["w_fc"] + params["b_fc"])
    return jnp.stack(outs, axis=1), jnp.stack(h, axis=0)


if __name__ == "__main__":
    # Lorenz system: 3-D input/output; small synthetic shapes.
    input_size, output_size, hidden_dim, n_layers = 3, 3, 32, 2
    batch, seq = 2, 8

    key = jax.random.PRNGKey(0)
    kx, kp = jax.random.split(key)
    x = jax.random.normal(kx, (batch, seq, input_size), jnp.float32)
    params = init_params(kp, input_size, hidden_dim, output_size, n_layers)

    fwd = jax.jit(functools.partial(rnn2_forward, n_layers=n_layers,
                                    hidden_dim=hidden_dim,
                                    output_size=output_size))
    out, hidden = fwd(x, params)
    jax.block_until_ready((out, hidden))

    out_r, hid_r = rnn2_ref(x, params, n_layers)
    assert out.shape == (batch, seq, output_size)
    assert hidden.shape == (n_layers, batch, hidden_dim)
    assert jnp.allclose(out, out_r, atol=1e-4, rtol=1e-4)
    assert jnp.allclose(hidden, hid_r, atol=1e-4, rtol=1e-4)

    print("KERNEL_OK")
</pallas_src>

<mosaic_0001>
module attributes {stable_mosaic.version = 11 : i64} {
  func.func @kernel(%arg0: i32, %arg1: i32, %arg2: memref<8x8x128xf32, #tpu.memory_space<vmem>>, %arg3: memref<128x128xf32, #tpu.memory_space<vmem>>, %arg4: memref<256x128xf32, #tpu.memory_space<vmem>>, %arg5: memref<1x128xf32, #tpu.memory_space<vmem>>, %arg6: memref<8x8x128xf32, #tpu.memory_space<vmem>>, %arg7: memref<2x8x128xf32, #tpu.memory_space<vmem>>) attributes {dimension_semantics = [#tpu.dimension_semantics<parallel>, #tpu.dimension_semantics<arbitrary>], iteration_bounds = array<i64: 1, 1>, scalar_prefetch = 0 : i64, scratch_operands = 0 : i64, tpu.core_type = #tpu.core_type<tc>, window_params = [{transform_indices = @transform_0, window_bounds = array<i64: 8, 8, 128>}, {pipeline_mode = #tpu.pipeline_mode<synchronous>, transform_indices = @transform_1, window_bounds = array<i64: 128, 128>}, {pipeline_mode = #tpu.pipeline_mode<synchronous>, transform_indices = @transform_2, window_bounds = array<i64: 256, 128>}, {pipeline_mode = #tpu.pipeline_mode<synchronous>, transform_indices = @transform_3, window_bounds = array<i64: 1, 128>}, {transform_indices = @transform_4, window_bounds = array<i64: 8, 8, 128>}, {transform_indices = @transform_5, window_bounds = array<i64: 2, 8, 128>}]} {
    %c0 = arith.constant 0 : index
    %c0_0 = arith.constant 0 : index
    %0 = vector.load %arg3[%c0, %c0_0] : memref<128x128xf32, #tpu.memory_space<vmem>>, vector<128x128xf32>
    %c0_1 = arith.constant 0 : index
    %c0_2 = arith.constant 0 : index
    %1 = vector.load %arg4[%c0_1, %c0_2] : memref<256x128xf32, #tpu.memory_space<vmem>>, vector<256x128xf32>
    %c0_3 = arith.constant 0 : index
    %c0_4 = arith.constant 0 : index
    %2 = vector.load %arg5[%c0_3, %c0_4] : memref<1x128xf32, #tpu.memory_space<vmem>>, vector<1x128xf32>
    %3 = vector.shape_cast %2 : vector<1x128xf32> to vector<1x128xf32>
    %4 = vector.broadcast %3 : vector<1x128xf32> to vector<8x128xf32>
    %cst = arith.constant 0.000000e+00 : f32
    %5 = vector.broadcast %cst : f32 to vector<8x128xf32>
    %c0_i32 = arith.constant 0 : i32
    %6 = arith.index_cast %c0_i32 : i32 to index
    %c0_5 = arith.constant 0 : index
    %c0_6 = arith.constant 0 : index
    %7 = vector.load %arg2[%6, %c0_5, %c0_6] : memref<8x8x128xf32, #tpu.memory_space<vmem>>, vector<1x8x128xf32>
    %8 = vector.shape_cast %7 : vector<1x8x128xf32> to vector<8x128xf32>
    %cst_7 = arith.constant dense<0.000000e+00> : vector<8x128xf32>
    %9 = tpu.matmul %5, %0, %cst_7 {dimension_numbers = #tpu.dot_dimension_numbers<[1], [0], [0], [1], [0, 0, 1, 1], [], []>} : vector<8x128xf32>, vector<128x128xf32>, vector<8x128xf32> -> vector<8x128xf32>
    %10 = arith.addf %8, %9 : vector<8x128xf32>
    %cst_8 = arith.constant 0.000000e+00 : f32
    %11 = vector.broadcast %cst_8 : f32 to vector<8x128xf32>
    %12 = arith.maximumf %10, %11 : vector<8x128xf32>
    %13 = tpu.concatenate %12, %5 in 1 : vector<8x128xf32>, vector<8x128xf32> -> vector<8x256xf32>
    %cst_9 = arith.constant dense<0.000000e+00> : vector<8x128xf32>
    %14 = tpu.matmul %13, %1, %cst_9 {dimension_numbers = #tpu.dot_dimension_numbers<[1], [0], [0], [1], [0, 0, 1, 1], [], []>} : vector<8x256xf32>, vector<256x128xf32>, vector<8x128xf32> -> vector<8x128xf32>
    %15 = arith.addf %14, %4 : vector<8x128xf32>
    %cst_10 = arith.constant 0.000000e+00 : f32
    %16 = vector.broadcast %cst_10 : f32 to vector<8x128xf32>
    %17 = arith.maximumf %15, %16 : vector<8x128xf32>
    %18 = arith.index_cast %c0_i32 : i32 to index
    %c0_11 = arith.constant 0 : index
    %c0_12 = arith.constant 0 : index
    %19 = vector.load %arg6[%18, %c0_11, %c0_12] : memref<8x8x128xf32, #tpu.memory_space<vmem>>, vector<1x8x128xf32>
    %20 = vector.shape_cast %19 : vector<1x8x128xf32> to vector<8x128xf32>
    %21 = vector.shape_cast %17 : vector<8x128xf32> to vector<1x8x128xf32>
    tpu.vector_store %arg6[%18, %c0_11, %c0_12], %21 {strides = array<i32>} : memref<8x8x128xf32, #tpu.memory_space<vmem>>, vector<1x8x128xf32>,
    %c1_i32 = arith.constant 1 : i32
    %22 = arith.index_cast %c1_i32 : i32 to index
    %c0_13 = arith.constant 0 : index
    %c0_14 = arith.constant 0 : index
    %23 = vector.load %arg2[%22, %c0_13, %c0_14] : memref<8x8x128xf32, #tpu.memory_space<vmem>>, vector<1x8x128xf32>
    %24 = vector.shape_cast %23 : vector<1x8x128xf32> to vector<8x128xf32>
    %cst_15 = arith.constant dense<0.000000e+00> : vector<8x128xf32>
    %25 = tpu.matmul %12, %0, %cst_15 {dimension_numbers = #tpu.dot_dimension_numbers<[1], [0], [0], [1], [0, 0, 1, 1], [], []>} : vector<8x128xf32>, vector<128x128xf32>, vector<8x128xf32> -> vector<8x128xf32>
    %26 = arith.addf %24, %25 : vector<8x128xf32>
    %cst_16 = arith.constant 0.000000e+00 : f32
    %27 = vector.broadcast %cst_16 : f32 to vector<8x128xf32>
    %28 = arith.maximumf %26, %27 : vector<8x128xf32>
    %29 = tpu.concatenate %28, %17 in 1 : vector<8x128xf32>, vector<8x128xf32> -> vector<8x256xf32>
    %cst_17 = arith.constant dense<0.000000e+00> : vector<8x128xf32>
    %30 = tpu.matmul %29, %1, %cst_17 {dimension_numbers = #tpu.dot_dimension_numbers<[1], [0], [0], [1], [0, 0, 1, 1], [], []>} : vector<8x256xf32>, vector<256x128xf32>, vector<8x128xf32> -> vector<8x128xf32>
    %31 = arith.addf %30, %4 : vector<8x128xf32>
    %cst_18 = arith.constant 0.000000e+00 : f32
    %32 = vector.broadcast %cst_18 : f32 to vector<8x128xf32>
    %33 = arith.maximumf %31, %32 : vector<8x128xf32>
    %34 = arith.index_cast %c1_i32 : i32 to index
    %c0_19 = arith.constant 0 : index
    %c0_20 = arith.constant 0 : index
    %35 = vector.load %arg6[%34, %c0_19, %c0_20] : memref<8x8x128xf32, #tpu.memory_space<vmem>>, vector<1x8x128xf32>
    %36 = vector.shape_cast %35 : vector<1x8x128xf32> to vector<8x128xf32>
    %37 = vector.shape_cast %33 : vector<8x128xf32> to vector<1x8x128xf32>
    tpu.vector_store %arg6[%34, %c0_19, %c0_20], %37 {strides = array<i32>} : memref<8x8x128xf32, #tpu.memory_space<vmem>>, vector<1x8x128xf32>,
    %c2_i32 = arith.constant 2 : i32
    %38 = arith.index_cast %c2_i32 : i32 to index
    %c0_21 = arith.constant 0 : index
    %c0_22 = arith.constant 0 : index
    %39 = vector.load %arg2[%38, %c0_21, %c0_22] : memref<8x8x128xf32, #tpu.memory_space<vmem>>, vector<1x8x128xf32>
    %40 = vector.shape_cast %39 : vector<1x8x128xf32> to vector<8x128xf32>
    %cst_23 = arith.constant dense<0.000000e+00> : vector<8x128xf32>
    %41 = tpu.matmul %28, %0, %cst_23 {dimension_numbers = #tpu.dot_dimension_numbers<[1], [0], [0], [1], [0, 0, 1, 1], [], []>} : vector<8x128xf32>, vector<128x128xf32>, vector<8x128xf32> -> vector<8x128xf32>
    %42 = arith.addf %40, %41 : vector<8x128xf32>
    %cst_24 = arith.constant 0.000000e+00 : f32
    %43 = vector.broadcast %cst_24 : f32 to vector<8x128xf32>
    %44 = arith.maximumf %42, %43 : vector<8x128xf32>
    %45 = tpu.concatenate %44, %33 in 1 : vector<8x128xf32>, vector<8x128xf32> -> vector<8x256xf32>
    %cst_25 = arith.constant dense<0.000000e+00> : vector<8x128xf32>
    %46 = tpu.matmul %45, %1, %cst_25 {dimension_numbers = #tpu.dot_dimension_numbers<[1], [0], [0], [1], [0, 0, 1, 1], [], []>} : vector<8x256xf32>, vector<256x128xf32>, vector<8x128xf32> -> vector<8x128xf32>
    %47 = arith.addf %46, %4 : vector<8x128xf32>
    %cst_26 = arith.constant 0.000000e+00 : f32
    %48 = vector.broadcast %cst_26 : f32 to vector<8x128xf32>
    %49 = arith.maximumf %47, %48 : vector<8x128xf32>
    %50 = arith.index_cast %c2_i32 : i32 to index
    %c0_27 = arith.constant 0 : index
    %c0_28 = arith.constant 0 : index
    %51 = vector.load %arg6[%50, %c0_27, %c0_28] : memref<8x8x128xf32, #tpu.memory_space<vmem>>, vector<1x8x128xf32>
    %52 = vector.shape_cast %51 : vector<1x8x128xf32> to vector<8x128xf32>
    %53 = vector.shape_cast %49 : vector<8x128xf32> to vector<1x8x128xf32>
    tpu.vector_store %arg6[%50, %c0_27, %c0_28], %53 {strides = array<i32>} : memref<8x8x128xf32, #tpu.memory_space<vmem>>, vector<1x8x128xf32>,
    %c3_i32 = arith.constant 3 : i32
    %54 = arith.index_cast %c3_i32 : i32 to index
    %c0_29 = arith.constant 0 : index
    %c0_30 = arith.constant 0 : index
    %55 = vector.load %arg2[%54, %c0_29, %c0_30] : memref<8x8x128xf32, #tpu.memory_space<vmem>>, vector<1x8x128xf32>
    %56 = vector.shape_cast %55 : vector<1x8x128xf32> to vector<8x128xf32>
    %cst_31 = arith.constant dense<0.000000e+00> : vector<8x128xf32>
    %57 = tpu.matmul %44, %0, %cst_31 {dimension_numbers = #tpu.dot_dimension_numbers<[1], [0], [0], [1], [0, 0, 1, 1], [], []>} : vector<8x128xf32>, vector<128x128xf32>, vector<8x128xf32> -> vector<8x128xf32>
    %58 = arith.addf %56, %57 : vector<8x128xf32>
    %cst_32 = arith.constant 0.000000e+00 : f32
    %59 = vector.broadcast %cst_32 : f32 to vector<8x128xf32>
    %60 = arith.maximumf %58, %59 : vector<8x128xf32>
    %61 = tpu.concatenate %60, %49 in 1 : vector<8x128xf32>, vector<8x128xf32> -> vector<8x256xf32>
    %cst_33 = arith.constant dense<0.000000e+00> : vector<8x128xf32>
    %62 = tpu.matmul %61, %1, %cst_33 {dimension_numbers = #tpu.dot_dimension_numbers<[1], [0], [0], [1], [0, 0, 1, 1], [], []>} : vector<8x256xf32>, vector<256x128xf32>, vector<8x128xf32> -> vector<8x128xf32>
    %63 = arith.addf %62, %4 : vector<8x128xf32>
    %cst_34 = arith.constant 0.000000e+00 : f32
    %64 = vector.broadcast %cst_34 : f32 to vector<8x128xf32>
    %65 = arith.maximumf %63, %64 : vector<8x128xf32>
    %66 = arith.index_cast %c3_i32 : i32 to index
    %c0_35 = arith.constant 0 : index
    %c0_36 = arith.constant 0 : index
    %67 = vector.load %arg6[%66, %c0_35, %c0_36] : memref<8x8x128xf32, #tpu.memory_space<vmem>>, vector<1x8x128xf32>
    %68 = vector.shape_cast %67 : vector<1x8x128xf32> to vector<8x128xf32>
    %69 = vector.shape_cast %65 : vector<8x128xf32> to vector<1x8x128xf32>
    tpu.vector_store %arg6[%66, %c0_35, %c0_36], %69 {strides = array<i32>} : memref<8x8x128xf32, #tpu.memory_space<vmem>>, vector<1x8x128xf32>,
    %c4_i32 = arith.constant 4 : i32
    %70 = arith.index_cast %c4_i32 : i32 to index
    %c0_37 = arith.constant 0 : index
    %c0_38 = arith.constant 0 : index
    %71 = vector.load %arg2[%70, %c0_37, %c0_38] : memref<8x8x128xf32, #tpu.memory_space<vmem>>, vector<1x8x128xf32>
    %72 = vector.shape_cast %71 : vector<1x8x128xf32> to vector<8x128xf32>
    %cst_39 = arith.constant dense<0.000000e+00> : vector<8x128xf32>
    %73 = tpu.matmul %60, %0, %cst_39 {dimension_numbers = #tpu.dot_dimension_numbers<[1], [0], [0], [1], [0, 0, 1, 1], [], []>} : vector<8x128xf32>, vector<128x128xf32>, vector<8x128xf32> -> vector<8x128xf32>
    %74 = arith.addf %72, %73 : vector<8x128xf32>
    %cst_40 = arith.constant 0.000000e+00 : f32
    %75 = vector.broadcast %cst_40 : f32 to vector<8x128xf32>
    %76 = arith.maximumf %74, %75 : vector<8x128xf32>
    %77 = tpu.concatenate %76, %65 in 1 : vector<8x128xf32>, vector<8x128xf32> -> vector<8x256xf32>
    %cst_41 = arith.constant dense<0.000000e+00> : vector<8x128xf32>
    %78 = tpu.matmul %77, %1, %cst_41 {dimension_numbers = #tpu.dot_dimension_numbers<[1], [0], [0], [1], [0, 0, 1, 1], [], []>} : vector<8x256xf32>, vector<256x128xf32>, vector<8x128xf32> -> vector<8x128xf32>
    %79 = arith.addf %78, %4 : vector<8x128xf32>
    %cst_42 = arith.constant 0.000000e+00 : f32
    %80 = vector.broadcast %cst_42 : f32 to vector<8x128xf32>
    %81 = arith.maximumf %79, %80 : vector<8x128xf32>
    %82 = arith.index_cast %c4_i32 : i32 to index
    %c0_43 = arith.constant 0 : index
    %c0_44 = arith.constant 0 : index
    %83 = vector.load %arg6[%82, %c0_43, %c0_44] : memref<8x8x128xf32, #tpu.memory_space<vmem>>, vector<1x8x128xf32>
    %84 = vector.shape_cast %83 : vector<1x8x128xf32> to vector<8x128xf32>
    %85 = vector.shape_cast %81 : vector<8x128xf32> to vector<1x8x128xf32>
    tpu.vector_store %arg6[%82, %c0_43, %c0_44], %85 {strides = array<i32>} : memref<8x8x128xf32, #tpu.memory_space<vmem>>, vector<1x8x128xf32>,
    %c5_i32 = arith.constant 5 : i32
    %86 = arith.index_cast %c5_i32 : i32 to index
    %c0_45 = arith.constant 0 : index
    %c0_46 = arith.constant 0 : index
    %87 = vector.load %arg2[%86, %c0_45, %c0_46] : memref<8x8x128xf32, #tpu.memory_space<vmem>>, vector<1x8x128xf32>
    %88 = vector.shape_cast %87 : vector<1x8x128xf32> to vector<8x128xf32>
    %cst_47 = arith.constant dense<0.000000e+00> : vector<8x128xf32>
    %89 = tpu.matmul %76, %0, %cst_47 {dimension_numbers = #tpu.dot_dimension_numbers<[1], [0], [0], [1], [0, 0, 1, 1], [], []>} : vector<8x128xf32>, vector<128x128xf32>, vector<8x128xf32> -> vector<8x128xf32>
    %90 = arith.addf %88, %89 : vector<8x128xf32>
    %cst_48 = arith.constant 0.000000e+00 : f32
    %91 = vector.broadcast %cst_48 : f32 to vector<8x128xf32>
    %92 = arith.maximumf %90, %91 : vector<8x128xf32>
    %93 = tpu.concatenate %92, %81 in 1 : vector<8x128xf32>, vector<8x128xf32> -> vector<8x256xf32>
    %cst_49 = arith.constant dense<0.000000e+00> : vector<8x128xf32>
    %94 = tpu.matmul %93, %1, %cst_49 {dimension_numbers = #tpu.dot_dimension_numbers<[1], [0], [0], [1], [0, 0, 1, 1], [], []>} : vector<8x256xf32>, vector<256x128xf32>, vector<8x128xf32> -> vector<8x128xf32>
    %95 = arith.addf %94, %4 : vector<8x128xf32>
    %cst_50 = arith.constant 0.000000e+00 : f32
    %96 = vector.broadcast %cst_50 : f32 to vector<8x128xf32>
    %97 = arith.maximumf %95, %96 : vector<8x128xf32>
    %98 = arith.index_cast %c5_i32 : i32 to index
    %c0_51 = arith.constant 0 : index
    %c0_52 = arith.constant 0 : index
    %99 = vector.load %arg6[%98, %c0_51, %c0_52] : memref<8x8x128xf32, #tpu.memory_space<vmem>>, vector<1x8x128xf32>
    %100 = vector.shape_cast %99 : vector<1x8x128xf32> to vector<8x128xf32>
    %101 = vector.shape_cast %97 : vector<8x128xf32> to vector<1x8x128xf32>
    tpu.vector_store %arg6[%98, %c0_51, %c0_52], %101 {strides = array<i32>} : memref<8x8x128xf32, #tpu.memory_space<vmem>>, vector<1x8x128xf32>,
    %c6_i32 = arith.constant 6 : i32
    %102 = arith.index_cast %c6_i32 : i32 to index
    %c0_53 = arith.constant 0 : index
    %c0_54 = arith.constant 0 : index
    %103 = vector.load %arg2[%102, %c0_53, %c0_54] : memref<8x8x128xf32, #tpu.memory_space<vmem>>, vector<1x8x128xf32>
    %104 = vector.shape_cast %103 : vector<1x8x128xf32> to vector<8x128xf32>
    %cst_55 = arith.constant dense<0.000000e+00> : vector<8x128xf32>
    %105 = tpu.matmul %92, %0, %cst_55 {dimension_numbers = #tpu.dot_dimension_numbers<[1], [0], [0], [1], [0, 0, 1, 1], [], []>} : vector<8x128xf32>, vector<128x128xf32>, vector<8x128xf32> -> vector<8x128xf32>
    %106 = arith.addf %104, %105 : vector<8x128xf32>
    %cst_56 = arith.constant 0.000000e+00 : f32
    %107 = vector.broadcast %cst_56 : f32 to vector<8x128xf32>
    %108 = arith.maximumf %106, %107 : vector<8x128xf32>
    %109 = tpu.concatenate %108, %97 in 1 : vector<8x128xf32>, vector<8x128xf32> -> vector<8x256xf32>
    %cst_57 = arith.constant dense<0.000000e+00> : vector<8x128xf32>
    %110 = tpu.matmul %109, %1, %cst_57 {dimension_numbers = #tpu.dot_dimension_numbers<[1], [0], [0], [1], [0, 0, 1, 1], [], []>} : vector<8x256xf32>, vector<256x128xf32>, vector<8x128xf32> -> vector<8x128xf32>
    %111 = arith.addf %110, %4 : vector<8x128xf32>
    %cst_58 = arith.constant 0.000000e+00 : f32
    %112 = vector.broadcast %cst_58 : f32 to vector<8x128xf32>
    %113 = arith.maximumf %111, %112 : vector<8x128xf32>
    %114 = arith.index_cast %c6_i32 : i32 to index
    %c0_59 = arith.constant 0 : index
    %c0_60 = arith.constant 0 : index
    %115 = vector.load %arg6[%114, %c0_59, %c0_60] : memref<8x8x128xf32, #tpu.memory_space<vmem>>, vector<1x8x128xf32>
    %116 = vector.shape_cast %115 : vector<1x8x128xf32> to vector<8x128xf32>
    %117 = vector.shape_cast %113 : vector<8x128xf32> to vector<1x8x128xf32>
    tpu.vector_store %arg6[%114, %c0_59, %c0_60], %117 {strides = array<i32>} : memref<8x8x128xf32, #tpu.memory_space<vmem>>, vector<1x8x128xf32>,
    %c7_i32 = arith.constant 7 : i32
    %118 = arith.index_cast %c7_i32 : i32 to index
    %c0_61 = arith.constant 0 : index
    %c0_62 = arith.constant 0 : index
    %119 = vector.load %arg2[%118, %c0_61, %c0_62] : memref<8x8x128xf32, #tpu.memory_space<vmem>>, vector<1x8x128xf32>
    %120 = vector.shape_cast %119 : vector<1x8x128xf32> to vector<8x128xf32>
    %cst_63 = arith.constant dense<0.000000e+00> : vector<8x128xf32>
    %121 = tpu.matmul %108, %0, %cst_63 {dimension_numbers = #tpu.dot_dimension_numbers<[1], [0], [0], [1], [0, 0, 1, 1], [], []>} : vector<8x128xf32>, vector<128x128xf32>, vector<8x128xf32> -> vector<8x128xf32>
    %122 = arith.addf %120, %121 : vector<8x128xf32>
    %cst_64 = arith.constant 0.000000e+00 : f32
    %123 = vector.broadcast %cst_64 : f32 to vector<8x128xf32>
    %124 = arith.maximumf %122, %123 : vector<8x128xf32>
    %125 = tpu.concatenate %124, %113 in 1 : vector<8x128xf32>, vector<8x128xf32> -> vector<8x256xf32>
    %cst_65 = arith.constant dense<0.000000e+00> : vector<8x128xf32>
    %126 = tpu.matmul %125, %1, %cst_65 {dimension_numbers = #tpu.dot_dimension_numbers<[1], [0], [0], [1], [0, 0, 1, 1], [], []>} : vector<8x256xf32>, vector<256x128xf32>, vector<8x128xf32> -> vector<8x128xf32>
    %127 = arith.addf %126, %4 : vector<8x128xf32>
    %cst_66 = arith.constant 0.000000e+00 : f32
    %128 = vector.broadcast %cst_66 : f32 to vector<8x128xf32>
    %129 = arith.maximumf %127, %128 : vector<8x128xf32>
    %130 = arith.index_cast %c7_i32 : i32 to index
    %c0_67 = arith.constant 0 : index
    %c0_68 = arith.constant 0 : index
    %131 = vector.load %arg6[%130, %c0_67, %c0_68] : memref<8x8x128xf32, #tpu.memory_space<vmem>>, vector<1x8x128xf32>
    %132 = vector.shape_cast %131 : vector<1x8x128xf32> to vector<8x128xf32>
    %133 = vector.shape_cast %129 : vector<8x128xf32> to vector<1x8x128xf32>
    tpu.vector_store %arg6[%130, %c0_67, %c0_68], %133 {strides = array<i32>} : memref<8x8x128xf32, #tpu.memory_space<vmem>>, vector<1x8x128xf32>,
    %c8_i32 = arith.constant 8 : i32
    %c0_69 = arith.constant 0 : index
    %c0_70 = arith.constant 0 : index
    %c0_71 = arith.constant 0 : index
    %134 = vector.load %arg7[%c0_69, %c0_70, %c0_71] : memref<2x8x128xf32, #tpu.memory_space<vmem>>, vector<1x8x128xf32>
    %135 = vector.shape_cast %134 : vector<1x8x128xf32> to vector<8x128xf32>
    %136 = vector.shape_cast %124 : vector<8x128xf32> to vector<1x8x128xf32>
    tpu.vector_store %arg7[%c0_69, %c0_70, %c0_71], %136 {strides = array<i32>} : memref<2x8x128xf32, #tpu.memory_space<vmem>>, vector<1x8x128xf32>,
    %c1 = arith.constant 1 : index
    %c0_72 = arith.constant 0 : index
    %c0_73 = arith.constant 0 : index
    %137 = vector.load %arg7[%c1, %c0_72, %c0_73] : memref<2x8x128xf32, #tpu.memory_space<vmem>>, vector<1x8x128xf32>
    %138 = vector.shape_cast %137 : vector<1x8x128xf32> to vector<8x128xf32>
    %139 = vector.shape_cast %129 : vector<8x128xf32> to vector<1x8x128xf32>
    tpu.vector_store %arg7[%c1, %c0_72, %c0_73], %139 {strides = array<i32>} : memref<2x8x128xf32, #tpu.memory_space<vmem>>, vector<1x8x128xf32>,
    return
  }
  func.func @transform_0(%arg0: i32, %arg1: i32) -> (i32, i32, i32) {
    %c0_i32 = arith.constant 0 : i32
    %c0_i32_0 = arith.constant 0 : i32
    return %arg1, %arg0, %c0_i32 : i32, i32, i32
  }
  func.func @transform_1(%arg0: i32, %arg1: i32) -> (i32, i32) {
    %c0_i32 = arith.constant 0 : i32
    %c0_i32_0 = arith.constant 0 : i32
    %c0_i32_1 = arith.constant 0 : i32
    return %c0_i32, %c0_i32_0 : i32, i32
  }
  func.func @transform_2(%arg0: i32, %arg1: i32) -> (i32, i32) {
    %c0_i32 = arith.constant 0 : i32
    %c0_i32_0 = arith.constant 0 : i32
    %c0_i32_1 = arith.constant 0 : i32
    return %c0_i32, %c0_i32_0 : i32, i32
  }
  func.func @transform_3(%arg0: i32, %arg1: i32) -> (i32, i32) {
    %c0_i32 = arith.constant 0 : i32
    %c0_i32_0 = arith.constant 0 : i32
    %c0_i32_1 = arith.constant 0 : i32
    return %c0_i32, %c0_i32_0 : i32, i32
  }
  func.func @transform_4(%arg0: i32, %arg1: i32) -> (i32, i32, i32) {
    %c0_i32 = arith.constant 0 : i32
    %c0_i32_0 = arith.constant 0 : i32
    return %arg1, %arg0, %c0_i32 : i32, i32, i32
  }
  func.func @transform_5(%arg0: i32, %arg1: i32) -> (i32, i32, i32) {
    %c0_i32 = arith.constant 0 : i32
    %c0_i32_0 = arith.constant 0 : i32
    %c0_i32_1 = arith.constant 0 : i32
    return %c0_i32, %arg0, %c0_i32_0 : i32, i32, i32
  }
}

</mosaic_0001>

<bundles_post_ra>
// kernel: rnn2_forward.1
= control target key start
LH: loop header
LB: loop body
LE: loop exit
PB: predicated region body
PF: predicated region fallthrough
CT: control target
= control target key end

     0   :  { %v2016_v0 = vmov 0.0   ;;  %vm2017_vm0 = vmmov 0   ;;  %s2984_s1 = inlined_call_operand.vmem [shape: f32[128,128], index: 1, kind: input, shape index: {}]   ;;  %s2985_s2 = inlined_call_operand.vmem [shape: f32[256,128], index: 2, kind: input, shape index: {}]   ;;  %s2986_s0 = inlined_call_operand.vmem [shape: f32[8,8,128], index: 0, kind: input, shape index: {}]   ;;  %s2987_s3 = inlined_call_operand.vmem [shape: f32[1,128], index: 3, kind: input, shape index: {}]   ;;  %s2988_s4 = inlined_call_operand.vmem [shape: f32[8,8,128], index: 4, kind: output, shape index: {0}]   ;;  %s2989_s5 = inlined_call_operand.vmem [shape: f32[2,8,128], index: 5, kind: output, shape index: {1}]  }
   0x1   :  { %1691 = vmatprep.subr.mxu0 %v2016_v0  ;;  %v2052_v1 = vld [vmem:[%s2984_s1 + $0x78] sm:$0xff]  ;;  %v2057_v2 = vld [vmem:[%s2984_s1 + $0x70] sm:$0xff]  ;;  %1723 = vmatprep.mubr.msk.f32.mxu0 %vm2017_vm0, %v2016_v0  ;;  %v2067_v3 = vld [vmem:[%s2984_s1 + $0x68] sm:$0xff] }
   0x2   :  { %1692 = vmatpush3.msra.mxu0 %v2052_v1  ;;  %211 = vmatprep.mubr.f32.mxu1 %v2016_v0  ;;  %v2074_v4 = vld [vmem:[%s2984_s1 + $0x60] sm:$0xff]  ;;  %v2080_v5 = vld [vmem:[%s2985_s2 + $0xf8] sm:$0xff]  ;;  %v2097_v8 = vld [vmem:[%s2985_s2 + $0xf0] sm:$0xff] }
   0x3   :  { %1693 = vmatprep.subr.mxu0 %v2016_v0  ;;  %v2085_v6 = vld [vmem:[%s2985_s2 + $0x78] sm:$0xff]  ;;  %1292 = vmatprep.subr.mxu1 %v2080_v5  ;;  %v2102_v9 = vld [vmem:[%s2985_s2 + $0x70] sm:$0xff]  ;;  %v2109_v10 = vld [vmem:[%s2985_s2 + $0xe8] sm:$0xff] }
   0x4   :  { %1694 = vmatpush3.msra.mxu0 %v2057_v2  ;;  %v2091_v7 = vld [vmem:[%s2984_s1 + $0x58] sm:$0xff]  ;;  %1293 = vmatpush3.msra.mxu1 %v2085_v6  ;;  %v2115_v11 = vld [vmem:[%s2984_s1 + $0x50] sm:$0xff]  ;;  %v2121_v12 = vld [vmem:[%s2985_s2 + $0x68] sm:$0xff] }
   0x5   :  { %1695 = vmatprep.subr.mxu0 %v2016_v0  ;;  %1294 = vmatprep.subr.mxu1 %v2097_v8  ;;  %v2128_v13 = vld [vmem:[%s2985_s2 + $0xe0] sm:$0xff]  ;;  %v2134_v14 = vld [vmem:[%s2984_s1 + $0x48] sm:$0xff]  ;;  %v2147_v16 = vld [vmem:[%s2985_s2 + $0xd8] sm:$0xff] }
   0x6   :  { %1696 = vmatpush3.msra.mxu0 %v2067_v3  ;;  %1295 = vmatpush3.msra.mxu1 %v2102_v9  ;;  %v2140_v15 = vld [vmem:[%s2985_s2 + $0x60] sm:$0xff]  ;;  %v2159_v18 = vld [vmem:[%s2985_s2 + $0x58] sm:$0xff]  ;;  %v2166_v19 = vld [vmem:[%s2985_s2 + $0xd0] sm:$0xff] }
   0x7   :  { %1697 = vmatprep.subr.mxu0 %v2016_v0  ;;  %1296 = vmatprep.subr.mxu1 %v2109_v10  ;;  %v2153_v17 = vld [vmem:[%s2984_s1 + $0x40] sm:$0xff]  ;;  %v2172_v20 = vld [vmem:[%s2984_s1 + $0x38] sm:$0xff]  ;;  %v2178_v21 = vld [vmem:[%s2985_s2 + $0x50] sm:$0xff] }
   0x8   :  { %1698 = vmatpush3.msra.mxu0 %v2074_v4  ;;  %1297 = vmatpush3.msra.mxu1 %v2121_v12  ;;  %v2185_v22 = vld [vmem:[%s2985_s2 + $0xc8] sm:$0xff]  ;;  %v2191_v23 = vld [vmem:[%s2984_s1 + $0x30] sm:$0xff]  ;;  %v2204_v25 = vld [vmem:[%s2985_s2 + $0xc0] sm:$0xff] }
   0x9   :  { %1699 = vmatprep.subr.mxu0 %v2016_v0  ;;  %1298 = vmatprep.subr.mxu1 %v2128_v13  ;;  %v2197_v24 = vld [vmem:[%s2985_s2 + $0x48] sm:$0xff]  ;;  %v2216_v27 = vld [vmem:[%s2985_s2 + $0x40] sm:$0xff]  ;;  %v2223_v28 = vld [vmem:[%s2985_s2 + $0xb8] sm:$0xff] }
   0xa   :  { %1700 = vmatpush3.msra.mxu0 %v2091_v7  ;;  %1299 = vmatpush3.msra.mxu1 %v2140_v15  ;;  %v2210_v26 = vld [vmem:[%s2984_s1 + $0x28] sm:$0xff]  ;;  %v2229_v29 = vld [vmem:[%s2984_s1 + $0x20] sm:$0xff]  ;;  %v2235_v30 = vld [vmem:[%s2985_s2 + $0x38] sm:$0xff] }
   0xb   :  { %1701 = vmatprep.subr.mxu0 %v2016_v0  ;;  %1300 = vmatprep.subr.mxu1 %v2147_v16  ;;  %v2242_v31 = vld [vmem:[%s2985_s2 + $0xb0] sm:$0xff]  ;;  %v2248_v32 = vld [vmem:[%s2984_s1 + $0x18] sm:$0xff]  ;;  %v2261_v34 = vld [vmem:[%s2985_s2 + $0xa8] sm:$0xff] }
   0xc   :  { %1702 = vmatpush3.msra.mxu0 %v2115_v11  ;;  %1301 = vmatpush3.msra.mxu1 %v2159_v18  ;;  %v2254_v33 = vld [vmem:[%s2985_s2 + $0x30] sm:$0xff]  ;;  %v2273_v36 = vld [vmem:[%s2985_s2 + $0x28] sm:$0xff]  ;;  %v2280_v37 = vld [vmem:[%s2985_s2 + $0xa0] sm:$0xff] }
   0xd   :  { %1703 = vmatprep.subr.mxu0 %v2016_v0  ;;  %1302 = vmatprep.subr.mxu1 %v2166_v19  ;;  %v2267_v35 = vld [vmem:[%s2984_s1 + $0x10] sm:$0xff]  ;;  %v2286_v38 = vld [vmem:[%s2984_s1 + $0x8] sm:$0xff]  ;;  %v2292_v39 = vld [vmem:[%s2985_s2 + $0x20] sm:$0xff] }
   0xe   :  { %1704 = vmatpush3.msra.mxu0 %v2134_v14  ;;  %1303 = vmatpush3.msra.mxu1 %v2178_v21  ;;  %v2299_v40 = vld [vmem:[%s2985_s2 + $0x98] sm:$0xff]  ;;  %v2305_v41 = vld [vmem:[%s2984_s1] sm:$0xff]  ;;  %v2320_v43 = vld [vmem:[%s2985_s2 + $0x90] sm:$0xff] }
   0xf   :  { %1705 = vmatprep.subr.mxu0 %v2016_v0  ;;  %1304 = vmatprep.subr.mxu1 %v2185_v22  ;;  %v2311_v42 = vld [vmem:[%s2985_s2 + $0x18] sm:$0xff]  ;;  %v2364_v44 = vld [vmem:[%s2985_s2 + $0x10] sm:$0xff]  ;;  %v2370_v45 = vld [vmem:[%s2985_s2 + $0x88] sm:$0xff] }
  0x10   :  { %1706 = vmatpush3.msra.mxu0 %v2153_v17  ;;  %1305 = vmatpush3.msra.mxu1 %v2197_v24  ;;  %v2376_v46 = vld [vmem:[%s2985_s2 + $0x8] sm:$0xff]  ;;  %v2382_v47 = vld [vmem:[%s2985_s2 + $0x80] sm:$0xff] }
  0x11   :  { %1707 = vmatprep.subr.mxu0 %v2016_v0  ;;  %1306 = vmatprep.subr.mxu1 %v2204_v25  ;;  %v2388_v48 = vld [vmem:[%s2985_s2] sm:$0xff]  ;;  %v1260_v54 = vld [vmem:[%s2986_s0 + $0x8] sm:$0xff] }
  0x12   :  { %1708 = vmatpush3.msra.mxu0 %v2172_v20  ;;  %1307 = vmatpush3.msra.mxu1 %v2216_v27  ;;  %v74_v49 = vld [vmem:[%s2986_s0] sm:$0xff] }
  0x13   :  { %1709 = vmatprep.subr.mxu0 %v2016_v0  ;;  %1308 = vmatprep.subr.mxu1 %v2223_v28  ;;  %v2467_v58 = vld [vmem:[%s2987_s3] ss:$0 sm:$0xff] }
  0x14   :  { %1710 = vmatpush3.msra.mxu0 %v2191_v23  ;;  %1309 = vmatpush3.msra.mxu1 %v2235_v30 }
  0x15   :  { %1711 = vmatprep.subr.mxu0 %v2016_v0  ;;  %1310 = vmatprep.subr.mxu1 %v2242_v31 }
  0x16   :  { %1712 = vmatpush3.msra.mxu0 %v2210_v26  ;;  %1311 = vmatpush3.msra.mxu1 %v2254_v33 }
  0x17   :  { %1713 = vmatprep.subr.mxu0 %v2016_v0  ;;  %1312 = vmatprep.subr.mxu1 %v2261_v34 }
  0x18   :  { %1714 = vmatpush3.msra.mxu0 %v2229_v29  ;;  %1313 = vmatpush3.msra.mxu1 %v2273_v36 }
  0x19   :  { %1715 = vmatprep.subr.mxu0 %v2016_v0  ;;  %1314 = vmatprep.subr.mxu1 %v2280_v37 }
  0x1a   :  { %1716 = vmatpush3.msra.mxu0 %v2248_v32  ;;  %1315 = vmatpush3.msra.mxu1 %v2292_v39 }
  0x1b   :  { %1717 = vmatprep.subr.mxu0 %v2016_v0  ;;  %1316 = vmatprep.subr.mxu1 %v2299_v40 }
  0x1c   :  { %1718 = vmatpush3.msra.mxu0 %v2267_v35  ;;  %1317 = vmatpush3.msra.mxu1 %v2311_v42 }
  0x1d   :  { %1719 = vmatprep.subr.mxu0 %v2016_v0  ;;  %1318 = vmatprep.subr.mxu1 %v2320_v43 }
  0x1e   :  { %1720 = vmatpush3.msra.mxu0 %v2286_v38  ;;  %1319 = vmatpush3.msra.mxu1 %v2364_v44 }
  0x1f   :  { %1721 = vmatprep.subr.mxu0 %v2016_v0  ;;  %1320 = vmatprep.subr.mxu1 %v2370_v45 }
  0x20   :  { %1722 = vmatpush3.msra.mxu0 %v2305_v41  ;;  %1321 = vmatpush3.msra.mxu1 %v2376_v46 }
  0x21   :  { %1724 = vmatmul.mubr.f32.vlgmr.msra.gmra.mxu0 %v2016_v0  ;;  %1726 = vmatprep.subr.mxu0 %v2016_v0 }
  0x22   :  { %1727 = vmatpush3.msra.mxu0 %v2052_v1  ;;  %1758 = vmatprep.mubr.msk.f32.mxu0 %vm2017_vm0, %v2016_v0 }
  0x23   :  { %1728 = vmatprep.subr.mxu0 %v2016_v0  ;;  %1322 = vmatprep.subr.mxu1 %v2382_v47 }
  0x24   :  { %1729 = vmatpush3.msra.mxu0 %v2057_v2  ;;  %1323 = vmatpush3.msra.mxu1 %v2388_v48 }
  0x25   :  { %1730 = vmatprep.subr.mxu0 %v2016_v0  ;;  %1344 = vmatprep.subr.mxu1 %v2080_v5 }
  0x26   :  { %1731 = vmatpush3.msra.mxu0 %v2067_v3 }
  0x27   :  { %1732 = vmatprep.subr.mxu0 %v2016_v0 }
  0x28   :  { %1733 = vmatpush3.msra.mxu0 %v2074_v4 }
  0x29   :  { %1734 = vmatprep.subr.mxu0 %v2016_v0 }
  0x2a   :  { %1735 = vmatpush3.msra.mxu0 %v2091_v7 }
  0x2b   :  { %1736 = vmatprep.subr.mxu0 %v2016_v0 }
  0x2c   :  { %1737 = vmatpush3.msra.mxu0 %v2115_v11 }
  0x2d   :  { %1738 = vmatprep.subr.mxu0 %v2016_v0 }
  0x2e   :  { %1739 = vmatpush3.msra.mxu0 %v2134_v14 }
  0x2f   :  { %1740 = vmatprep.subr.mxu0 %v2016_v0 }
  0x30   :  { %1741 = vmatpush3.msra.mxu0 %v2153_v17 }
  0x31   :  { %1742 = vmatprep.subr.mxu0 %v2016_v0 }
  0x32   :  { %1743 = vmatpush3.msra.mxu0 %v2172_v20 }
  0x33   :  { %1744 = vmatprep.subr.mxu0 %v2016_v0 }
  0x34   :  { %1745 = vmatpush3.msra.mxu0 %v2191_v23 }
  0x35   :  { %1746 = vmatprep.subr.mxu0 %v2016_v0 }
  0x36   :  { %1747 = vmatpush3.msra.mxu0 %v2210_v26 }
  0x37   :  { %1748 = vmatprep.subr.mxu0 %v2016_v0 }
  0x38   :  { %1749 = vmatpush3.msra.mxu0 %v2229_v29 }
  0x39   :  { %1750 = vmatprep.subr.mxu0 %v2016_v0 }
  0x3a   :  { %1751 = vmatpush3.msra.mxu0 %v2248_v32 }
  0x3b   :  { %1752 = vmatprep.subr.mxu0 %v2016_v0 }
  0x3c   :  { %1753 = vmatpush3.msra.mxu0 %v2267_v35 }
  0x3d   :  { %1754 = vmatprep.subr.mxu0 %v2016_v0 }
  0x3e   :  { %1755 = vmatpush3.msra.mxu0 %v2286_v38 }
  0x3f   :  { %1756 = vmatprep.subr.mxu0 %v2016_v0 }
  0x40   :  { %1757 = vmatpush3.msra.mxu0 %v2305_v41 }
  0x41   :  { %1761 = vmatprep.subr.mxu0 %v2016_v0 }
  0xe1   :  { %v141_v50 = vpop.f32.mrf.mxu0 }
  0xe2   :  { %v145_v51 = vadd.f32 %v141_v50, %v74_v49  ;;  %v1262_v50 = vld [vmem:[%s2986_s0 + $0x10] sm:$0xff] }
  0xe3   :  { %v1725_v52 = vpop.f32.mrf.mxu0 }
  0xe4   :  { %v146_v53 = vmax.f32 %v145_v51, 0.0 }
  0xe6   :  { %212 = vmatmul.mubr.f32.vlgmr.msra.gmra.mxu1 %v146_v53  ;;  %1759 = vmatmul.mubr.f32.vlgmr.msra.gmra.mxu0 %v146_v53 }
  0xe7   :  { %1762 = vmatpush3.msra.mxu0 %v2052_v1  ;;  %1345 = vmatpush3.msra.mxu1 %v2085_v6 }
  0xe8   :  { %1763 = vmatprep.subr.mxu0 %v2016_v0  ;;  %1346 = vmatprep.subr.mxu1 %v2097_v8 }
  0xe9   :  { %1764 = vmatpush3.msra.mxu0 %v2057_v2  ;;  %1347 = vmatpush3.msra.mxu1 %v2102_v9 }
  0xea   :  { %1765 = vmatprep.subr.mxu0 %v2016_v0  ;;  %1348 = vmatprep.subr.mxu1 %v2109_v10 }
  0xeb   :  { %1766 = vmatpush3.msra.mxu0 %v2067_v3  ;;  %1349 = vmatpush3.msra.mxu1 %v2121_v12 }
  0xec   :  { %1767 = vmatprep.subr.mxu0 %v2016_v0  ;;  %1350 = vmatprep.subr.mxu1 %v2128_v13 }
  0xed   :  { %1768 = vmatpush3.msra.mxu0 %v2074_v4  ;;  %1351 = vmatpush3.msra.mxu1 %v2140_v15 }
  0xee   :  { %1769 = vmatprep.subr.mxu0 %v2016_v0  ;;  %1352 = vmatprep.subr.mxu1 %v2147_v16 }
  0xef   :  { %1770 = vmatpush3.msra.mxu0 %v2091_v7  ;;  %1353 = vmatpush3.msra.mxu1 %v2159_v18 }
  0xf0   :  { %1771 = vmatprep.subr.mxu0 %v2016_v0  ;;  %1354 = vmatprep.subr.mxu1 %v2166_v19 }
  0xf1   :  { %1772 = vmatpush3.msra.mxu0 %v2115_v11  ;;  %1355 = vmatpush3.msra.mxu1 %v2178_v21 }
  0xf2   :  { %1773 = vmatprep.subr.mxu0 %v2016_v0  ;;  %1356 = vmatprep.subr.mxu1 %v2185_v22 }
  0xf3   :  { %1774 = vmatpush3.msra.mxu0 %v2134_v14  ;;  %1357 = vmatpush3.msra.mxu1 %v2197_v24 }
  0xf4   :  { %1775 = vmatprep.subr.mxu0 %v2016_v0  ;;  %1358 = vmatprep.subr.mxu1 %v2204_v25 }
  0xf5   :  { %1776 = vmatpush3.msra.mxu0 %v2153_v17  ;;  %1359 = vmatpush3.msra.mxu1 %v2216_v27 }
  0xf6   :  { %1777 = vmatprep.subr.mxu0 %v2016_v0  ;;  %1360 = vmatprep.subr.mxu1 %v2223_v28 }
  0xf7   :  { %1778 = vmatpush3.msra.mxu0 %v2172_v20  ;;  %1361 = vmatpush3.msra.mxu1 %v2235_v30 }
  0xf8   :  { %1779 = vmatprep.subr.mxu0 %v2016_v0  ;;  %1362 = vmatprep.subr.mxu1 %v2242_v31 }
  0xf9   :  { %1780 = vmatpush3.msra.mxu0 %v2191_v23  ;;  %1363 = vmatpush3.msra.mxu1 %v2254_v33 }
  0xfa   :  { %1781 = vmatprep.subr.mxu0 %v2016_v0  ;;  %1364 = vmatprep.subr.mxu1 %v2261_v34 }
  0xfb   :  { %1782 = vmatpush3.msra.mxu0 %v2210_v26  ;;  %1365 = vmatpush3.msra.mxu1 %v2273_v36 }
  0xfc   :  { %1783 = vmatprep.subr.mxu0 %v2016_v0  ;;  %1366 = vmatprep.subr.mxu1 %v2280_v37 }
  0xfd   :  { %1784 = vmatpush3.msra.mxu0 %v2229_v29  ;;  %1367 = vmatpush3.msra.mxu1 %v2292_v39 }
  0xfe   :  { %1785 = vmatprep.subr.mxu0 %v2016_v0  ;;  %1368 = vmatprep.subr.mxu1 %v2299_v40 }
  0xff   :  { %1786 = vmatpush3.msra.mxu0 %v2248_v32  ;;  %1369 = vmatpush3.msra.mxu1 %v2311_v42 }
 0x100   :  { %1787 = vmatprep.subr.mxu0 %v2016_v0  ;;  %1370 = vmatprep.subr.mxu1 %v2320_v43 }
 0x101   :  { %1788 = vmatpush3.msra.mxu0 %v2267_v35  ;;  %1793 = vmatprep.mubr.msk.f32.mxu0 %vm2017_vm0, %v2016_v0 }
 0x102   :  { %1789 = vmatprep.subr.mxu0 %v2016_v0  ;;  %1371 = vmatpush3.msra.mxu1 %v2364_v44 }
 0x103   :  { %1790 = vmatpush3.msra.mxu0 %v2286_v38  ;;  %1372 = vmatprep.subr.mxu1 %v2370_v45 }
 0x104   :  { %1791 = vmatprep.subr.mxu0 %v2016_v0  ;;  %1373 = vmatpush3.msra.mxu1 %v2376_v46 }
 0x105   :  { %1792 = vmatpush3.msra.mxu0 %v2305_v41  ;;  %1374 = vmatprep.subr.mxu1 %v2382_v47 }
 0x106   :  { %1375 = vmatpush3.msra.mxu1 %v2388_v48  ;;  %1796 = vmatprep.subr.mxu0 %v2016_v0 }
 0x107   :  { %1396 = vmatprep.subr.mxu1 %v2080_v5 }
 0x1a6   :  { %v1324_v55 = vpop.f32.mrf.mxu1  ;;  %v287_v56 = vpop.f32.mrf.mxu0 }
 0x1a7   :  { %v291_v57 = vadd.f32 %v1260_v54, %v287_v56 }
 0x1a8   :  { %v1325_v59 = vpop.f32.mrf.mxu1  ;;  %v1760_v60 = vpop.f32.mrf.mxu0 }
 0x1a9   :  { %v292_v61 = vmax.f32 %v291_v57, 0.0  ;;  %v1326_v62 = vadd.f32 %v1325_v59, %v1324_v55 }
 0x1ab   :  { %v214_v63 = vadd.f32 %v1326_v62, %v2467_v58  ;;  %1794 = vmatmul.mubr.f32.vlgmr.msra.gmra.mxu0 %v292_v61 }
 0x1ac   :  { %1797 = vmatpush3.msra.mxu0 %v2052_v1  ;;  %1828 = vmatprep.mubr.msk.f32.mxu0 %vm2017_vm0, %v2016_v0 }
 0x1ad   :  { %v217_v49 = vmax.f32 %v214_v63, 0.0  ;;  %1798 = vmatprep.subr.mxu0 %v2016_v0 }
 0x1ae   :  { %1799 = vmatpush3.msra.mxu0 %v2057_v2 }
 0x1af   :  { %218 = vst [vmem:[%s2988_s4] sm:$0xff] %v217_v49  ;;  %357 = vmatprep.mubr.f32.mxu1 %v217_v49  ;;  %1800 = vmatprep.subr.mxu0 %v2016_v0 }
 0x1b0   :  { %358 = vmatmul.mubr.f32.vlgmr.msra.gmra.mxu1 %v292_v61  ;;  %1801 = vmatpush3.msra.mxu0 %v2067_v3  ;;  %v1264_v61 = vld [vmem:[%s2986_s0 + $0x18] sm:$0xff] }
 0x1b1   :  { %1802 = vmatprep.subr.mxu0 %v2016_v0  ;;  %1397 = vmatpush3.msra.mxu1 %v2085_v6 }
 0x1b2   :  { %1803 = vmatpush3.msra.mxu0 %v2074_v4  ;;  %1398 = vmatprep.subr.mxu1 %v2097_v8 }
 0x1b3   :  { %1804 = vmatprep.subr.mxu0 %v2016_v0  ;;  %1399 = vmatpush3.msra.mxu1 %v2102_v9 }
 0x1b4   :  { %1805 = vmatpush3.msra.mxu0 %v2091_v7  ;;  %1400 = vmatprep.subr.mxu1 %v2109_v10 }
 0x1b5   :  { %1806 = vmatprep.subr.mxu0 %v2016_v0  ;;  %1401 = vmatpush3.msra.mxu1 %v2121_v12 }
 0x1b6   :  { %1807 = vmatpush3.msra.mxu0 %v2115_v11  ;;  %1402 = vmatprep.subr.mxu1 %v2128_v13 }
 0x1b7   :  { %1808 = vmatprep.subr.mxu0 %v2016_v0  ;;  %1403 = vmatpush3.msra.mxu1 %v2140_v15 }
 0x1b8   :  { %1809 = vmatpush3.msra.mxu0 %v2134_v14  ;;  %1404 = vmatprep.subr.mxu1 %v2147_v16 }
 0x1b9   :  { %1810 = vmatprep.subr.mxu0 %v2016_v0  ;;  %1405 = vmatpush3.msra.mxu1 %v2159_v18 }
 0x1ba   :  { %1811 = vmatpush3.msra.mxu0 %v2153_v17  ;;  %1406 = vmatprep.subr.mxu1 %v2166_v19 }
 0x1bb   :  { %1812 = vmatprep.subr.mxu0 %v2016_v0  ;;  %1407 = vmatpush3.msra.mxu1 %v2178_v21 }
 0x1bc   :  { %1813 = vmatpush3.msra.mxu0 %v2172_v20  ;;  %1408 = vmatprep.subr.mxu1 %v2185_v22 }
 0x1bd   :  { %1814 = vmatprep.subr.mxu0 %v2016_v0  ;;  %1409 = vmatpush3.msra.mxu1 %v2197_v24 }
 0x1be   :  { %1815 = vmatpush3.msra.mxu0 %v2191_v23  ;;  %1410 = vmatprep.subr.mxu1 %v2204_v25 }
 0x1bf   :  { %1816 = vmatprep.subr.mxu0 %v2016_v0  ;;  %1411 = vmatpush3.msra.mxu1 %v2216_v27 }
 0x1c0   :  { %1817 = vmatpush3.msra.mxu0 %v2210_v26  ;;  %1412 = vmatprep.subr.mxu1 %v2223_v28 }
 0x1c1   :  { %1818 = vmatprep.subr.mxu0 %v2016_v0  ;;  %1413 = vmatpush3.msra.mxu1 %v2235_v30 }
 0x1c2   :  { %1819 = vmatpush3.msra.mxu0 %v2229_v29  ;;  %1414 = vmatprep.subr.mxu1 %v2242_v31 }
 0x1c3   :  { %1820 = vmatprep.subr.mxu0 %v2016_v0  ;;  %1415 = vmatpush3.msra.mxu1 %v2254_v33 }
 0x1c4   :  { %1821 = vmatpush3.msra.mxu0 %v2248_v32  ;;  %1416 = vmatprep.subr.mxu1 %v2261_v34 }
 0x1c5   :  { %1822 = vmatprep.subr.mxu0 %v2016_v0  ;;  %1417 = vmatpush3.msra.mxu1 %v2273_v36 }
 0x1c6   :  { %1823 = vmatpush3.msra.mxu0 %v2267_v35  ;;  %1418 = vmatprep.subr.mxu1 %v2280_v37 }
 0x1c7   :  { %1824 = vmatprep.subr.mxu0 %v2016_v0  ;;  %1419 = vmatpush3.msra.mxu1 %v2292_v39 }
 0x1c8   :  { %1825 = vmatpush3.msra.mxu0 %v2286_v38  ;;  %1420 = vmatprep.subr.mxu1 %v2299_v40 }
 0x1c9   :  { %1826 = vmatprep.subr.mxu0 %v2016_v0  ;;  %1421 = vmatpush3.msra.mxu1 %v2311_v42 }
 0x1ca   :  { %1827 = vmatpush3.msra.mxu0 %v2305_v41  ;;  %1422 = vmatprep.subr.mxu1 %v2320_v43 }
 0x1cb   :  { %1423 = vmatpush3.msra.mxu1 %v2364_v44  ;;  %1831 = vmatprep.subr.mxu0 %v2016_v0 }
 0x1cc   :  { %1424 = vmatprep.subr.mxu1 %v2370_v45 }
 0x1cd   :  { %1425 = vmatpush3.msra.mxu1 %v2376_v46 }
 0x1ce   :  { %1426 = vmatprep.subr.mxu1 %v2382_v47 }
 0x1cf   :  { %1427 = vmatpush3.msra.mxu1 %v2388_v48 }
 0x1d0   :  { %1448 = vmatprep.subr.mxu1 %v2080_v5 }
 0x26b   :  { %v434_v51 = vpop.f32.mrf.mxu0 }
 0x26c   :  { %v438_v52 = vadd.f32 %v1262_v50, %v434_v51 }
 0x26d   :  { %v1795_v53 = vpop.f32.mrf.mxu0 }
 0x26e   :  { %v439_v54 = vmax.f32 %v438_v52, 0.0 }
 0x270   :  { %v1376_v55 = vpop.f32.mrf.mxu1  ;;  %1829 = vmatmul.mubr.f32.vlgmr.msra.gmra.mxu0 %v439_v54 }
 0x271   :  { %1832 = vmatpush3.msra.mxu0 %v2052_v1  ;;  %1863 = vmatprep.mubr.msk.f32.mxu0 %vm2017_vm0, %v2016_v0 }
 0x272   :  { %v1377_v56 = vpop.f32.mrf.mxu1  ;;  %1833 = vmatprep.subr.mxu0 %v2016_v0 }
 0x273   :  { %v1378_v57 = vadd.f32 %v1377_v56, %v1376_v55  ;;  %1834 = vmatpush3.msra.mxu0 %v2057_v2  ;;  %v1266_v56 = vld [vmem:[%s2986_s0 + $0x20] sm:$0xff] }
 0x274   :  { %1835 = vmatprep.subr.mxu0 %v2016_v0 }
 0x275   :  { %v360_v59 = vadd.f32 %v1378_v57, %v2467_v58  ;;  %1836 = vmatpush3.msra.mxu0 %v2067_v3 }
 0x276   :  { %1837 = vmatprep.subr.mxu0 %v2016_v0 }
 0x277   :  { %v363_v60 = vmax.f32 %v360_v59, 0.0  ;;  %1838 = vmatpush3.msra.mxu0 %v2074_v4 }
 0x278   :  { %1839 = vmatprep.subr.mxu0 %v2016_v0 }
 0x279   :  { %1261 = vst [vmem:[%s2988_s4 + $0x8] sm:$0xff] %v363_v60  ;;  %504 = vmatprep.mubr.f32.mxu1 %v363_v60  ;;  %1840 = vmatpush3.msra.mxu0 %v2091_v7 }
 0x27a   :  { %505 = vmatmul.mubr.f32.vlgmr.msra.gmra.mxu1 %v439_v54  ;;  %1841 = vmatprep.subr.mxu0 %v2016_v0 }
 0x27b   :  { %1842 = vmatpush3.msra.mxu0 %v2115_v11  ;;  %1449 = vmatpush3.msra.mxu1 %v2085_v6 }
 0x27c   :  { %1843 = vmatprep.subr.mxu0 %v2016_v0  ;;  %1450 = vmatprep.subr.mxu1 %v2097_v8 }
 0x27d   :  { %1844 = vmatpush3.msra.mxu0 %v2134_v14  ;;  %1451 = vmatpush3.msra.mxu1 %v2102_v9 }
 0x27e   :  { %1845 = vmatprep.subr.mxu0 %v2016_v0  ;;  %1452 = vmatprep.subr.mxu1 %v2109_v10 }
 0x27f   :  { %1846 = vmatpush3.msra.mxu0 %v2153_v17  ;;  %1453 = vmatpush3.msra.mxu1 %v2121_v12 }
 0x280   :  { %1847 = vmatprep.subr.mxu0 %v2016_v0  ;;  %1454 = vmatprep.subr.mxu1 %v2128_v13 }
 0x281   :  { %1848 = vmatpush3.msra.mxu0 %v2172_v20  ;;  %1455 = vmatpush3.msra.mxu1 %v2140_v15 }
 0x282   :  { %1849 = vmatprep.subr.mxu0 %v2016_v0  ;;  %1456 = vmatprep.subr.mxu1 %v2147_v16 }
 0x283   :  { %1850 = vmatpush3.msra.mxu0 %v2191_v23  ;;  %1457 = vmatpush3.msra.mxu1 %v2159_v18 }
 0x284   :  { %1851 = vmatprep.subr.mxu0 %v2016_v0  ;;  %1458 = vmatprep.subr.mxu1 %v2166_v19 }
 0x285   :  { %1852 = vmatpush3.msra.mxu0 %v2210_v26  ;;  %1459 = vmatpush3.msra.mxu1 %v2178_v21 }
 0x286   :  { %1853 = vmatprep.subr.mxu0 %v2016_v0  ;;  %1460 = vmatprep.subr.mxu1 %v2185_v22 }
 0x287   :  { %1854 = vmatpush3.msra.mxu0 %v2229_v29  ;;  %1461 = vmatpush3.msra.mxu1 %v2197_v24 }
 0x288   :  { %1855 = vmatprep.subr.mxu0 %v2016_v0  ;;  %1462 = vmatprep.subr.mxu1 %v2204_v25 }
 0x289   :  { %1856 = vmatpush3.msra.mxu0 %v2248_v32  ;;  %1463 = vmatpush3.msra.mxu1 %v2216_v27 }
 0x28a   :  { %1857 = vmatprep.subr.mxu0 %v2016_v0  ;;  %1464 = vmatprep.subr.mxu1 %v2223_v28 }
 0x28b   :  { %1858 = vmatpush3.msra.mxu0 %v2267_v35  ;;  %1465 = vmatpush3.msra.mxu1 %v2235_v30 }
 0x28c   :  { %1859 = vmatprep.subr.mxu0 %v2016_v0  ;;  %1466 = vmatprep.subr.mxu1 %v2242_v31 }
 0x28d   :  { %1860 = vmatpush3.msra.mxu0 %v2286_v38  ;;  %1467 = vmatpush3.msra.mxu1 %v2254_v33 }
 0x28e   :  { %1861 = vmatprep.subr.mxu0 %v2016_v0  ;;  %1468 = vmatprep.subr.mxu1 %v2261_v34 }
 0x28f   :  { %1862 = vmatpush3.msra.mxu0 %v2305_v41  ;;  %1469 = vmatpush3.msra.mxu1 %v2273_v36 }
 0x290   :  { %1470 = vmatprep.subr.mxu1 %v2280_v37  ;;  %1866 = vmatprep.subr.mxu0 %v2016_v0 }
 0x291   :  { %1471 = vmatpush3.msra.mxu1 %v2292_v39 }
 0x292   :  { %1472 = vmatprep.subr.mxu1 %v2299_v40 }
 0x293   :  { %1473 = vmatpush3.msra.mxu1 %v2311_v42 }
 0x294   :  { %1474 = vmatprep.subr.mxu1 %v2320_v43 }
 0x295   :  { %1475 = vmatpush3.msra.mxu1 %v2364_v44 }
 0x296   :  { %1476 = vmatprep.subr.mxu1 %v2370_v45 }
 0x297   :  { %1477 = vmatpush3.msra.mxu1 %v2376_v46 }
 0x298   :  { %1478 = vmatprep.subr.mxu1 %v2382_v47 }
 0x299   :  { %1479 = vmatpush3.msra.mxu1 %v2388_v48 }
 0x29a   :  { %1500 = vmatprep.subr.mxu1 %v2080_v5 }
 0x330   :  { %v581_v62 = vpop.f32.mrf.mxu0 }
 0x331   :  { %v585_v63 = vadd.f32 %v1264_v61, %v581_v62  ;;  %v2002_v62 = vld [vmem:[%s2985_s2 + $0xb0] sm:$0xff] }
 0x332   :  { %v1830_v49 = vpop.f32.mrf.mxu0 }
 0x333   :  { %v586_v50 = vmax.f32 %v585_v63, 0.0  ;;  %v2003_v63 = vld [vmem:[%s2985_s2 + $0x30] sm:$0xff]  ;;  %v2004_v49 = vld [vmem:[%s2985_s2 + $0xa8] sm:$0xff] }
 0x335   :  { %1864 = vmatmul.mubr.f32.vlgmr.msra.gmra.mxu0 %v586_v50 }
 0x336   :  { %1867 = vmatpush3.msra.mxu0 %v2052_v1  ;;  %1898 = vmatprep.mubr.msk.f32.mxu0 %vm2017_vm0, %v2016_v0 }
 0x337   :  { %1868 = vmatprep.subr.mxu0 %v2016_v0 }
 0x338   :  { %1869 = vmatpush3.msra.mxu0 %v2057_v2 }
 0x339   :  { %1870 = vmatprep.subr.mxu0 %v2016_v0 }
 0x33a   :  { %v1428_v51 = vpop.f32.mrf.mxu1  ;;  %1871 = vmatpush3.msra.mxu0 %v2067_v3 }
 0x33b   :  { %1872 = vmatprep.subr.mxu0 %v2016_v0 }
 0x33c   :  { %v1429_v52 = vpop.f32.mrf.mxu1  ;;  %1873 = vmatpush3.msra.mxu0 %v2074_v4 }
 0x33d   :  { %v1430_v53 = vadd.f32 %v1429_v52, %v1428_v51  ;;  %1874 = vmatprep.subr.mxu0 %v2016_v0  ;;  %v2006_v51 = vld [vmem:[%s2985_s2 + $0xa0] sm:$0xff] }
 0x33e   :  { %1875 = vmatpush3.msra.mxu0 %v2091_v7  ;;  %v2007_v52 = vld [vmem:[%s2985_s2 + $0x20] sm:$0xff] }
 0x33f   :  { %v507_v54 = vadd.f32 %v1430_v53, %v2467_v58  ;;  %1876 = vmatprep.subr.mxu0 %v2016_v0  ;;  %v2008_v53 = vld [vmem:[%s2985_s2 + $0x98] sm:$0xff] }
 0x340   :  { %1877 = vmatpush3.msra.mxu0 %v2115_v11 }
 0x341   :  { %v510_v55 = vmax.f32 %v507_v54, 0.0  ;;  %1878 = vmatprep.subr.mxu0 %v2016_v0  ;;  %v2009_v54 = vld [vmem:[%s2985_s2 + $0x18] sm:$0xff] }
 0x342   :  { %1879 = vmatpush3.msra.mxu0 %v2134_v14 }
 0x343   :  { %1263 = vst [vmem:[%s2988_s4 + $0x10] sm:$0xff] %v510_v55  ;;  %651 = vmatprep.mubr.f32.mxu1 %v510_v55  ;;  %1880 = vmatprep.subr.mxu0 %v2016_v0  ;;  %v2010_v55 = vld [vmem:[%s2985_s2 + $0x90] sm:$0xff] }
 0x344   :  { %652 = vmatmul.mubr.f32.vlgmr.msra.gmra.mxu1 %v586_v50  ;;  %1881 = vmatpush3.msra.mxu0 %v2153_v17  ;;  %v2005_v50 = vld [vmem:[%s2985_s2 + $0x28] sm:$0xff] }
 0x345   :  { %1882 = vmatprep.subr.mxu0 %v2016_v0  ;;  %1501 = vmatpush3.msra.mxu1 %v2085_v6 }
 0x346   :  { %1883 = vmatpush3.msra.mxu0 %v2172_v20  ;;  %1502 = vmatprep.subr.mxu1 %v2097_v8 }
 0x347   :  { %1884 = vmatprep.subr.mxu0 %v2016_v0  ;;  %1503 = vmatpush3.msra.mxu1 %v2102_v9 }
 0x348   :  { %1885 = vmatpush3.msra.mxu0 %v2191_v23  ;;  %1504 = vmatprep.subr.mxu1 %v2109_v10 }
 0x349   :  { %1886 = vmatprep.subr.mxu0 %v2016_v0  ;;  %1505 = vmatpush3.msra.mxu1 %v2121_v12 }
 0x34a   :  { %1887 = vmatpush3.msra.mxu0 %v2210_v26  ;;  %1506 = vmatprep.subr.mxu1 %v2128_v13 }
 0x34b   :  { %1888 = vmatprep.subr.mxu0 %v2016_v0  ;;  %1507 = vmatpush3.msra.mxu1 %v2140_v15 }
 0x34c   :  { %1889 = vmatpush3.msra.mxu0 %v2229_v29  ;;  %1508 = vmatprep.subr.mxu1 %v2147_v16 }
 0x34d   :  { %1890 = vmatprep.subr.mxu0 %v2016_v0  ;;  %1509 = vmatpush3.msra.mxu1 %v2159_v18 }
 0x34e   :  { %1891 = vmatpush3.msra.mxu0 %v2248_v32  ;;  %1510 = vmatprep.subr.mxu1 %v2166_v19 }
 0x34f   :  { %1892 = vmatprep.subr.mxu0 %v2016_v0  ;;  %1511 = vmatpush3.msra.mxu1 %v2178_v21 }
 0x350   :  { %1893 = vmatpush3.msra.mxu0 %v2267_v35  ;;  %1512 = vmatprep.subr.mxu1 %v2185_v22 }
 0x351   :  { %1894 = vmatprep.subr.mxu0 %v2016_v0  ;;  %1513 = vmatpush3.msra.mxu1 %v2197_v24 }
 0x352   :  { %1895 = vmatpush3.msra.mxu0 %v2286_v38  ;;  %1514 = vmatprep.subr.mxu1 %v2204_v25 }
 0x353   :  { %1896 = vmatprep.subr.mxu0 %v2016_v0  ;;  %1515 = vmatpush3.msra.mxu1 %v2216_v27 }
 0x354   :  { %1897 = vmatpush3.msra.mxu0 %v2305_v41  ;;  %1516 = vmatprep.subr.mxu1 %v2223_v28 }
 0x355   :  { %1517 = vmatpush3.msra.mxu1 %v2235_v30  ;;  %1901 = vmatprep.subr.mxu0 %v2016_v0 }
 0x356   :  { %1518 = vmatprep.subr.mxu1 %v2242_v31 }
 0x357   :  { %1519 = vmatpush3.msra.mxu1 %v2254_v33 }
 0x358   :  { %1520 = vmatprep.subr.mxu1 %v2261_v34 }
 0x359   :  { %1521 = vmatpush3.msra.mxu1 %v2273_v36 }
 0x35a   :  { %1522 = vmatprep.subr.mxu1 %v2280_v37 }
 0x35b   :  { %1523 = vmatpush3.msra.mxu1 %v2292_v39 }
 0x35c   :  { %1524 = vmatprep.subr.mxu1 %v2299_v40 }
 0x35d   :  { %1525 = vmatpush3.msra.mxu1 %v2311_v42 }
 0x35e   :  { %1526 = vmatprep.subr.mxu1 %v2320_v43 }
 0x35f   :  { %1527 = vmatpush3.msra.mxu1 %v2364_v44 }
 0x360   :  { %1528 = vmatprep.subr.mxu1 %v2370_v45 }
 0x361   :  { %1529 = vmatpush3.msra.mxu1 %v2376_v46 }
 0x362   :  { %1530 = vmatprep.subr.mxu1 %v2382_v47 }
 0x363   :  { %1531 = vmatpush3.msra.mxu1 %v2388_v48 }
 0x364   :  { %1552 = vmatprep.subr.mxu1 %v2080_v5 }
 0x3f5   :  { %v728_v57 = vpop.f32.mrf.mxu0 }
 0x3f6   :  { %v732_v59 = vadd.f32 %v1266_v56, %v728_v57  ;;  %v1270_v56 = vld [vmem:[%s2986_s0 + $0x30] sm:$0xff] }
 0x3f7   :  { %v1865_v60 = vpop.f32.mrf.mxu0 }
 0x3f8   :  { %v733_v61 = vmax.f32 %v732_v59, 0.0 }
 0x3fa   :  { %1899 = vmatmul.mubr.f32.vlgmr.msra.gmra.mxu0 %v733_v61 }
 0x3fb   :  { %1902 = vmatpush3.msra.mxu0 %v2052_v1  ;;  %1933 = vmatprep.mubr.msk.f32.mxu0 %vm2017_vm0, %v2016_v0 }
 0x3fc   :  { %1903 = vmatprep.subr.mxu0 %v2016_v0 }
 0x3fd   :  { %1904 = vmatpush3.msra.mxu0 %v2057_v2 }
 0x3fe   :  { %1905 = vmatprep.subr.mxu0 %v2016_v0 }
 0x3ff   :  { %1906 = vmatpush3.msra.mxu0 %v2067_v3 }
 0x400   :  { %1907 = vmatprep.subr.mxu0 %v2016_v0 }
 0x401   :  { %1908 = vmatpush3.msra.mxu0 %v2074_v4 }
 0x402   :  { %1909 = vmatprep.subr.mxu0 %v2016_v0 }
 0x403   :  { %1910 = vmatpush3.msra.mxu0 %v2091_v7  ;;  %v1268_v7 = vld [vmem:[%s2986_s0 + $0x28] sm:$0xff] }
 0x404   :  { %v1480_v1 = vpop.f32.mrf.mxu1  ;;  %1911 = vmatprep.subr.mxu0 %v2016_v0 }
 0x405   :  { %1912 = vmatpush3.msra.mxu0 %v2115_v11 }
 0x406   :  { %v1481_v5 = vpop.f32.mrf.mxu1  ;;  %1913 = vmatprep.subr.mxu0 %v2016_v0 }
 0x407   :  { %v1482_v2 = vadd.f32 %v1481_v5, %v1480_v1  ;;  %1914 = vmatpush3.msra.mxu0 %v2134_v14  ;;  %v1976_v14 = vld [vmem:[%s2984_s1 + $0x68] sm:$0xff] }
 0x408   :  { %1915 = vmatprep.subr.mxu0 %v2016_v0 }
 0x409   :  { %v654_v3 = vadd.f32 %v1482_v2, %v2467_v58  ;;  %1916 = vmatpush3.msra.mxu0 %v2153_v17  ;;  %v1979_v17 = vld [vmem:[%s2984_s1 + $0x50] sm:$0xff]  ;;  %v2013_v2 = vld [vmem:[%s2985_s2 + $0x8] sm:$0xff] }
 0x40a   :  { %1917 = vmatprep.subr.mxu0 %v2016_v0 }
 0x40b   :  { %v657_v4 = vmax.f32 %v654_v3, 0.0  ;;  %1918 = vmatpush3.msra.mxu0 %v2172_v20  ;;  %v1981_v20 = vld [vmem:[%s2984_s1 + $0x40] sm:$0xff] }
 0x40c   :  { %1919 = vmatprep.subr.mxu0 %v2016_v0  ;;  %v2014_v3 = vld [vmem:[%s2985_s2 + $0x80] sm:$0xff] }
 0x40d   :  { %1265 = vst [vmem:[%s2988_s4 + $0x18] sm:$0xff] %v657_v4  ;;  %798 = vmatprep.mubr.f32.mxu1 %v657_v4  ;;  %1920 = vmatpush3.msra.mxu0 %v2191_v23  ;;  %v2015_v4 = vld [vmem:[%s2985_s2] sm:$0xff] }
 0x40e   :  { %799 = vmatmul.mubr.f32.vlgmr.msra.gmra.mxu1 %v733_v61  ;;  %1921 = vmatprep.subr.mxu0 %v2016_v0 }
 0x40f   :  { %1922 = vmatpush3.msra.mxu0 %v2210_v26  ;;  %1553 = vmatpush3.msra.mxu1 %v2085_v6  ;;  %v2760_v6 = vld [vmem:[%s2985_s2 + $0xf8] sm:$0xff]  ;;  %v1984_v26 = vld [vmem:[%s2984_s1 + $0x28] sm:$0xff] }
 0x410   :  { %1923 = vmatprep.subr.mxu0 %v2016_v0  ;;  %1554 = vmatprep.subr.mxu1 %v2097_v8 }
 0x411   :  { %1924 = vmatpush3.msra.mxu0 %v2229_v29  ;;  %1555 = vmatpush3.msra.mxu1 %v2102_v9 }
 0x412   :  { %1925 = vmatprep.subr.mxu0 %v2016_v0  ;;  %1556 = vmatprep.subr.mxu1 %v2109_v10 }
 0x413   :  { %1926 = vmatpush3.msra.mxu0 %v2248_v32  ;;  %1557 = vmatpush3.msra.mxu1 %v2121_v12  ;;  %v1974_v12 = vld [vmem:[%s2984_s1 + $0x78] sm:$0xff] }
 0x414   :  { %1927 = vmatprep.subr.mxu0 %v2016_v0  ;;  %1558 = vmatprep.subr.mxu1 %v2128_v13  ;;  %v1975_v13 = vld [vmem:[%s2984_s1 + $0x70] sm:$0xff] }
 0x415   :  { %1928 = vmatpush3.msra.mxu0 %v2267_v35  ;;  %1559 = vmatpush3.msra.mxu1 %v2140_v15  ;;  %v1977_v15 = vld [vmem:[%s2984_s1 + $0x60] sm:$0xff] }
 0x416   :  { %1929 = vmatprep.subr.mxu0 %v2016_v0  ;;  %1560 = vmatprep.subr.mxu1 %v2147_v16  ;;  %v1978_v16 = vld [vmem:[%s2984_s1 + $0x58] sm:$0xff] }
 0x417   :  { %1930 = vmatpush3.msra.mxu0 %v2286_v38  ;;  %1561 = vmatpush3.msra.mxu1 %v2159_v18  ;;  %v1980_v18 = vld [vmem:[%s2984_s1 + $0x48] sm:$0xff] }
 0x418   :  { %1931 = vmatprep.subr.mxu0 %v2016_v0  ;;  %1562 = vmatprep.subr.mxu1 %v2166_v19 }
 0x419   :  { %1932 = vmatpush3.msra.mxu0 %v2305_v41  ;;  %1563 = vmatpush3.msra.mxu1 %v2178_v21 }
 0x41a   :  { %1564 = vmatprep.subr.mxu1 %v2185_v22  ;;  %1936 = vmatprep.subr.mxu0 %v2016_v0  ;;  %v1982_v22 = vld [vmem:[%s2984_s1 + $0x38] sm:$0xff] }
 0x41b   :  { %1565 = vmatpush3.msra.mxu1 %v2197_v24  ;;  %v1983_v24 = vld [vmem:[%s2984_s1 + $0x30] sm:$0xff] }
 0x41c   :  { %1566 = vmatprep.subr.mxu1 %v2204_v25 }
 0x41d   :  { %1567 = vmatpush3.msra.mxu1 %v2216_v27 }
 0x41e   :  { %1568 = vmatprep.subr.mxu1 %v2223_v28  ;;  %v2823_v28 = vld [vmem:[%s2985_s2 + $0x78] sm:$0xff] }
 0x41f   :  { %1569 = vmatpush3.msra.mxu1 %v2235_v30  ;;  %v2837_v30 = vld [vmem:[%s2985_s2 + $0x70] sm:$0xff] }
 0x420   :  { %1570 = vmatprep.subr.mxu1 %v2242_v31  ;;  %v2844_v31 = vld [vmem:[%s2985_s2 + $0xe8] sm:$0xff] }
 0x421   :  { %1571 = vmatpush3.msra.mxu1 %v2254_v33  ;;  %v2858_v33 = vld [vmem:[%s2985_s2 + $0xe0] sm:$0xff] }
 0x422   :  { %1572 = vmatprep.subr.mxu1 %v2261_v34  ;;  %v2870_v34 = vld [vmem:[%s2985_s2 + $0xd8] sm:$0xff] }
 0x423   :  { %1573 = vmatpush3.msra.mxu1 %v2273_v36  ;;  %v1994_v36 = vld [vmem:[%s2985_s2 + $0xd0] sm:$0xff] }
 0x424   :  { %1574 = vmatprep.subr.mxu1 %v2280_v37  ;;  %v1995_v37 = vld [vmem:[%s2985_s2 + $0x50] sm:$0xff] }
 0x425   :  { %1575 = vmatpush3.msra.mxu1 %v2292_v39  ;;  %v1997_v39 = vld [vmem:[%s2985_s2 + $0x48] sm:$0xff] }
 0x426   :  { %1576 = vmatprep.subr.mxu1 %v2299_v40  ;;  %v1998_v40 = vld [vmem:[%s2985_s2 + $0xc0] sm:$0xff] }
 0x427   :  { %1577 = vmatpush3.msra.mxu1 %v2311_v42  ;;  %v2000_v42 = vld [vmem:[%s2985_s2 + $0xb8] sm:$0xff] }
 0x428   :  { %1578 = vmatprep.subr.mxu1 %v2320_v43  ;;  %v2001_v43 = vld [vmem:[%s2985_s2 + $0x38] sm:$0xff] }
 0x429   :  { %1579 = vmatpush3.msra.mxu1 %v2364_v44 }
 0x42a   :  { %1580 = vmatprep.subr.mxu1 %v2370_v45 }
 0x42b   :  { %1581 = vmatpush3.msra.mxu1 %v2376_v46 }
 0x42c   :  { %1582 = vmatprep.subr.mxu1 %v2382_v47 }
 0x42d   :  { %1583 = vmatpush3.msra.mxu1 %v2388_v48 }
 0x42e   :  { %1604 = vmatprep.subr.mxu1 %v2760_v6 }
 0x4ba   :  { %v875_v8 = vpop.f32.mrf.mxu0 }
 0x4bb   :  { %v879_v9 = vadd.f32 %v1268_v7, %v875_v8 }
 0x4bc   :  { %v1900_v10 = vpop.f32.mrf.mxu0 }
 0x4bd   :  { %v880_v11 = vmax.f32 %v879_v9, 0.0 }
 0x4bf   :  { %1934 = vmatmul.mubr.f32.vlgmr.msra.gmra.mxu0 %v880_v11 }
 0x4c0   :  { %1937 = vmatpush3.msra.mxu0 %v1974_v12  ;;  %1968 = vmatprep.mubr.msk.f32.mxu0 %vm2017_vm0, %v2016_v0 }
 0x4c1   :  { %1938 = vmatprep.subr.mxu0 %v2016_v0 }
 0x4c2   :  { %1939 = vmatpush3.msra.mxu0 %v1975_v13 }
 0x4c3   :  { %1940 = vmatprep.subr.mxu0 %v2016_v0 }
 0x4c4   :  { %1941 = vmatpush3.msra.mxu0 %v1976_v14 }
 0x4c5   :  { %1942 = vmatprep.subr.mxu0 %v2016_v0 }
 0x4c6   :  { %1943 = vmatpush3.msra.mxu0 %v1977_v15 }
 0x4c7   :  { %1944 = vmatprep.subr.mxu0 %v2016_v0 }
 0x4c8   :  { %1945 = vmatpush3.msra.mxu0 %v1978_v16 }
 0x4c9   :  { %1946 = vmatprep.subr.mxu0 %v2016_v0 }
 0x4ca   :  { %1947 = vmatpush3.msra.mxu0 %v1979_v17 }
 0x4cb   :  { %1948 = vmatprep.subr.mxu0 %v2016_v0 }
 0x4cc   :  { %1949 = vmatpush3.msra.mxu0 %v1980_v18 }
 0x4cd   :  { %1950 = vmatprep.subr.mxu0 %v2016_v0 }
 0x4ce   :  { %v1532_v19 = vpop.f32.mrf.mxu1  ;;  %1951 = vmatpush3.msra.mxu0 %v1981_v20 }
 0x4cf   :  { %1952 = vmatprep.subr.mxu0 %v2016_v0 }
 0x4d0   :  { %v1533_v21 = vpop.f32.mrf.mxu1  ;;  %1953 = vmatpush3.msra.mxu0 %v1982_v22 }
 0x4d1   :  { %v1534_v23 = vadd.f32 %v1533_v21, %v1532_v19  ;;  %1954 = vmatprep.subr.mxu0 %v2016_v0 }
 0x4d2   :  { %1955 = vmatpush3.msra.mxu0 %v1983_v24 }
 0x4d3   :  { %v801_v25 = vadd.f32 %v1534_v23, %v2467_v58  ;;  %1956 = vmatprep.subr.mxu0 %v2016_v0 }
 0x4d4   :  { %1957 = vmatpush3.msra.mxu0 %v1984_v26 }
 0x4d5   :  { %v804_v27 = vmax.f32 %v801_v25, 0.0  ;;  %1958 = vmatprep.subr.mxu0 %v2016_v0 }
 0x4d6   :  { %1959 = vmatpush3.msra.mxu0 %v2229_v29  ;;  %v2830_v29 = vld [vmem:[%s2985_s2 + $0xf0] sm:$0xff] }
 0x4d7   :  { %1267 = vst [vmem:[%s2988_s4 + $0x20] sm:$0xff] %v804_v27  ;;  %945 = vmatprep.mubr.f32.mxu1 %v804_v27  ;;  %1960 = vmatprep.subr.mxu0 %v2016_v0 }
 0x4d8   :  { %946 = vmatmul.mubr.f32.vlgmr.msra.gmra.mxu1 %v880_v11  ;;  %1961 = vmatpush3.msra.mxu0 %v2248_v32  ;;  %v2851_v32 = vld [vmem:[%s2985_s2 + $0x68] sm:$0xff] }
 0x4d9   :  { %1962 = vmatprep.subr.mxu0 %v2016_v0  ;;  %1605 = vmatpush3.msra.mxu1 %v2823_v28 }
 0x4da   :  { %1963 = vmatpush3.msra.mxu0 %v2267_v35  ;;  %1606 = vmatprep.subr.mxu1 %v2830_v29  ;;  %v2876_v35 = vld [vmem:[%s2985_s2 + $0x58] sm:$0xff] }
 0x4db   :  { %1964 = vmatprep.subr.mxu0 %v2016_v0  ;;  %1607 = vmatpush3.msra.mxu1 %v2837_v30 }
 0x4dc   :  { %1965 = vmatpush3.msra.mxu0 %v2286_v38  ;;  %1608 = vmatprep.subr.mxu1 %v2844_v31  ;;  %v1996_v38 = vld [vmem:[%s2985_s2 + $0xc8] sm:$0xff] }
 0x4dd   :  { %1966 = vmatprep.subr.mxu0 %v2016_v0  ;;  %1609 = vmatpush3.msra.mxu1 %v2851_v32  ;;  %v2864_v0 = vld [vmem:[%s2985_s2 + $0x60] sm:$0xff] }
 0x4de   :  { %1967 = vmatpush3.msra.mxu0 %v2305_v41  ;;  %1610 = vmatprep.subr.mxu1 %v2858_v33  ;;  %v1999_v41 = vld [vmem:[%s2985_s2 + $0x40] sm:$0xff] }
 0x4df   :  { %1611 = vmatpush3.msra.mxu1 %v2864_v0 }
 0x4e0   :  { %1612 = vmatprep.subr.mxu1 %v2870_v34 }
 0x4e1   :  { %1613 = vmatpush3.msra.mxu1 %v2876_v35 }
 0x4e2   :  { %1614 = vmatprep.subr.mxu1 %v1994_v36 }
 0x4e3   :  { %1615 = vmatpush3.msra.mxu1 %v1995_v37 }
 0x4e4   :  { %1616 = vmatprep.subr.mxu1 %v1996_v38 }
 0x4e5   :  { %1617 = vmatpush3.msra.mxu1 %v1997_v39 }
 0x4e6   :  { %1618 = vmatprep.subr.mxu1 %v1998_v40 }
 0x4e7   :  { %1619 = vmatpush3.msra.mxu1 %v1999_v41 }
 0x4e8   :  { %1620 = vmatprep.subr.mxu1 %v2000_v42 }
 0x4e9   :  { %1621 = vmatpush3.msra.mxu1 %v2001_v43 }
 0x4ea   :  { %1622 = vmatprep.subr.mxu1 %v2002_v62 }
 0x4eb   :  { %1623 = vmatpush3.msra.mxu1 %v2003_v63 }
 0x4ec   :  { %1624 = vmatprep.subr.mxu1 %v2004_v49 }
 0x4ed   :  { %1625 = vmatpush3.msra.mxu1 %v2005_v50 }
 0x4ee   :  { %1626 = vmatprep.subr.mxu1 %v2006_v51 }
 0x4ef   :  { %1627 = vmatpush3.msra.mxu1 %v2007_v52 }
 0x4f0   :  { %1628 = vmatprep.subr.mxu1 %v2008_v53 }
 0x4f1   :  { %1629 = vmatpush3.msra.mxu1 %v2009_v54 }
 0x4f2   :  { %1630 = vmatprep.subr.mxu1 %v2010_v55 }
 0x4f3   :  { %1631 = vmatpush3.msra.mxu1 %v2364_v44 }
 0x4f4   :  { %1632 = vmatprep.subr.mxu1 %v2370_v45 }
 0x4f5   :  { %1633 = vmatpush3.msra.mxu1 %v2376_v46 }
 0x4f6   :  { %1634 = vmatprep.subr.mxu1 %v2382_v47  ;;  %v2011_v47 = vld [vmem:[%s2985_s2 + $0x10] sm:$0xff] }
 0x4f7   :  { %1635 = vmatpush3.msra.mxu1 %v2388_v48  ;;  %v2012_v48 = vld [vmem:[%s2985_s2 + $0x88] sm:$0xff] }
 0x4f8   :  { %1656 = vmatprep.subr.mxu1 %v2760_v6  ;;  %v1272_v6 = vld [vmem:[%s2986_s0 + $0x38] sm:$0xff] }
 0x57f   :  { %v1022_v57 = vpop.f32.mrf.mxu0 }
 0x580   :  { %v1026_v59 = vadd.f32 %v1270_v56, %v1022_v57 }
 0x581   :  { %v1935_v60 = vpop.f32.mrf.mxu0 }
 0x582   :  { %v1027_v61 = vmax.f32 %v1026_v59, 0.0 }
 0x584   :  { %1969 = vmatmul.mubr.f32.vlgmr.msra.gmra.mxu0 %v1027_v61 }
 0x598   :  { %v1584_v44 = vpop.f32.mrf.mxu1 }
 0x59a   :  { %v1585_v1 = vpop.f32.mrf.mxu1 }
 0x59b   :  { %v1586_v45 = vadd.f32 %v1585_v1, %v1584_v44 }
 0x59d   :  { %v948_v46 = vadd.f32 %v1586_v45, %v2467_v58 }
 0x59f   :  { %v951_v5 = vmax.f32 %v948_v46, 0.0 }
 0x5a1   :  { %1269 = vst [vmem:[%s2988_s4 + $0x28] sm:$0xff] %v951_v5  ;;  %1092 = vmatprep.mubr.f32.mxu1 %v951_v5 }
 0x5a2   :  { %1093 = vmatmul.mubr.f32.vlgmr.msra.gmra.mxu1 %v1027_v61 }
 0x5a3   :  { %1657 = vmatpush3.msra.mxu1 %v2823_v28 }
 0x5a4   :  { %1658 = vmatprep.subr.mxu1 %v2830_v29 }
 0x5a5   :  { %1659 = vmatpush3.msra.mxu1 %v2837_v30 }
 0x5a6   :  { %1660 = vmatprep.subr.mxu1 %v2844_v31 }
 0x5a7   :  { %1661 = vmatpush3.msra.mxu1 %v2851_v32 }
 0x5a8   :  { %1662 = vmatprep.subr.mxu1 %v2858_v33 }
 0x5a9   :  { %1663 = vmatpush3.msra.mxu1 %v2864_v0 }
 0x5aa   :  { %1664 = vmatprep.subr.mxu1 %v2870_v34 }
 0x5ab   :  { %1665 = vmatpush3.msra.mxu1 %v2876_v35 }
 0x5ac   :  { %1666 = vmatprep.subr.mxu1 %v1994_v36 }
 0x5ad   :  { %1667 = vmatpush3.msra.mxu1 %v1995_v37 }
 0x5ae   :  { %1668 = vmatprep.subr.mxu1 %v1996_v38 }
 0x5af   :  { %1669 = vmatpush3.msra.mxu1 %v1997_v39 }
 0x5b0   :  { %1670 = vmatprep.subr.mxu1 %v1998_v40 }
 0x5b1   :  { %1671 = vmatpush3.msra.mxu1 %v1999_v41 }
 0x5b2   :  { %1672 = vmatprep.subr.mxu1 %v2000_v42 }
 0x5b3   :  { %1673 = vmatpush3.msra.mxu1 %v2001_v43 }
 0x5b4   :  { %1674 = vmatprep.subr.mxu1 %v2002_v62 }
 0x5b5   :  { %1675 = vmatpush3.msra.mxu1 %v2003_v63 }
 0x5b6   :  { %1676 = vmatprep.subr.mxu1 %v2004_v49 }
 0x5b7   :  { %1677 = vmatpush3.msra.mxu1 %v2005_v50 }
 0x5b8   :  { %1678 = vmatprep.subr.mxu1 %v2006_v51 }
 0x5b9   :  { %1679 = vmatpush3.msra.mxu1 %v2007_v52 }
 0x5ba   :  { %1680 = vmatprep.subr.mxu1 %v2008_v53 }
 0x5bb   :  { %1681 = vmatpush3.msra.mxu1 %v2009_v54 }
 0x5bc   :  { %1682 = vmatprep.subr.mxu1 %v2010_v55 }
 0x5bd   :  { %1683 = vmatpush3.msra.mxu1 %v2011_v47 }
 0x5be   :  { %1684 = vmatprep.subr.mxu1 %v2012_v48 }
 0x5bf   :  { %1685 = vmatpush3.msra.mxu1 %v2013_v2 }
 0x5c0   :  { %1686 = vmatprep.subr.mxu1 %v2014_v3 }
 0x5c1   :  { %1687 = vmatpush3.msra.mxu1 %v2015_v4 }
 0x644   :  { %v1169_v7 = vpop.f32.mrf.mxu0 }
 0x645   :  { %v1173_v8 = vadd.f32 %v1272_v6, %v1169_v7 }
 0x646   :  { %v1970_v9 = vpop.f32.mrf.mxu0 }
 0x647   :  { %v1174_v10 = vmax.f32 %v1173_v8, 0.0 }
 0x649   :  { %1248 = vst [vmem:[%s2989_s5] sm:$0xff] %v1174_v10 }
 0x662   :  { %v1636_v11 = vpop.f32.mrf.mxu1 }
 0x664   :  { %v1637_v12 = vpop.f32.mrf.mxu1 }
 0x665   :  { %v1638_v13 = vadd.f32 %v1637_v12, %v1636_v11 }
 0x667   :  { %v1095_v14 = vadd.f32 %v1638_v13, %v2467_v58 }
 0x669   :  { %v1098_v15 = vmax.f32 %v1095_v14, 0.0 }
 0x66b   :  { %1271 = vst [vmem:[%s2988_s4 + $0x30] sm:$0xff] %v1098_v15  ;;  %1239 = vmatprep.mubr.f32.mxu1 %v1098_v15 }
 0x66c   :  { %1240 = vmatmul.mubr.f32.vlgmr.msra.gmra.mxu1 %v1174_v10 }
 0x72c   :  { %v1688_v16 = vpop.f32.mrf.mxu1 }
 0x72e   :  { %v1689_v17 = vpop.f32.mrf.mxu1 }
 0x72f   :  { %v1690_v18 = vadd.f32 %v1689_v17, %v1688_v16 }
 0x731   :  { %v1242_v19 = vadd.f32 %v1690_v18, %v2467_v58 }
 0x733   :  { %v1245_v20 = vmax.f32 %v1242_v19, 0.0 }
 0x735   :  { %1273 = vst [vmem:[%s2988_s4 + $0x38] sm:$0xff] %v1245_v20  ;;  %1274 = vst [vmem:[%s2989_s5 + $0x8] sm:$0xff] %v1245_v20 }

</bundles_post_ra>
